<compile_context>
chip_gen: v6e
topology: v6e:2x2x1
jax: 0.10.0
libtpu: 0.0.40
codegen_flags: <defaults>
</compile_context>

<pallas_src>
import math
import functools

import jax
import jax.numpy as jnp
from jax.experimental import pallas as pl
from jax.experimental.pallas import tpu as pltpu


@functools.lru_cache(maxsize=None)
def _vmem_limit_bytes():
    # Per-generation scoped-VMEM limit: ~3/4 of capacity, capped at 100 MiB
    # (v5e/v6e have 128 MiB, v7x only 64 MiB).  Falls back to 48 MiB.
    try:
        info = pltpu.get_tpu_info()
        cap = int(getattr(info, "vmem_capacity_bytes", 64 * 1024 * 1024))
        return int(min(cap * 3 // 4, 100 * 1024 * 1024))
    except Exception:
        return 48 * 1024 * 1024


def _round_up(x, m):
    return (x + m - 1) // m * m


# ----------------------------------------------------------------------------
# Fused encoder-layer kernel:
#   qkv proj -> batched per-head attention -> out proj -> +residual -> LN1
#   -> gate softmax -> in-kernel top-k routing -> experts -> weighted combine
#   -> +residual -> LN2
# Grid: (B,), one batch element per step ("parallel" -> megacore sharding).
# ----------------------------------------------------------------------------

def _encoder_layer_kernel(num_heads, top_k,
                          x_ref, wqkv_ref, bqkv_ref, wo_ref, bo_ref,
                          wg_ref, bg_ref, ln1_g_ref, ln1_b_ref,
                          w1_ref, b1_ref, w2_ref, b2_ref,
                          ln2_g_ref, ln2_b_ref, o_ref):
    x = x_ref[0]                                       # (S, D) f32
    S, D = x.shape
    H = num_heads
    Dh = D // H
    E = w1_ref.shape[0]

    x_bf = x.astype(jnp.bfloat16)

    # --- fused QKV projection (bf16 weights already, f32 accumulation) ------
    qkv = jnp.dot(x_bf, wqkv_ref[...],
                  preferred_element_type=jnp.float32) + bqkv_ref[...]   # (S,3D)

    # --- batched per-head attention (no head loop, no concatenate) ----------
    # One relayout to head-major, then two batched MXU contractions.
    qkv_h = pltpu.einshape("sgd->gsd", qkv.reshape(S, 3 * H, Dh))  # (3H, S, Dh)
    q = qkv_h[:H].astype(jnp.bfloat16)            # 1/sqrt(Dh) folded into wq/bq
    k = qkv_h[H:2 * H].astype(jnp.bfloat16)
    v = qkv_h[2 * H:].astype(jnp.bfloat16)

    s = jnp.einsum('hqd,hkd->hqk', q, k,
                   preferred_element_type=jnp.float32)              # (H, S, S)
    s = s - jnp.max(s, axis=-1, keepdims=True)
    p = jnp.exp(s)                                                  # f32 (v5e)
    p = p * pl.reciprocal(jnp.sum(p, axis=-1, keepdims=True), approx=True)
    attn = jnp.einsum('hqk,hkd->hqd', p.astype(jnp.bfloat16), v,
                      preferred_element_type=jnp.float32)           # (H, S, Dh)
    attn = pltpu.einshape("hsd->shd", attn).reshape(S, D)           # (S, D)

    # --- output projection + residual + LN1 (dropout = identity) ------------
    attn = jnp.dot(attn.astype(jnp.bfloat16), wo_ref[...],
                   preferred_element_type=jnp.float32) + bo_ref[...]
    y = x + attn
    mu = jnp.mean(y, axis=-1, keepdims=True)
    var = jnp.mean((y - mu) ** 2, axis=-1, keepdims=True)
    y_ln = (y - mu) * jax.lax.rsqrt(var + 1e-5) * ln1_g_ref[...] + ln1_b_ref[...]
    y_ln_bf = y_ln.astype(jnp.bfloat16)

    # --- MoE router: gate softmax + fused top-k (iterative max + mask) ------
    logits = jnp.dot(y_ln_bf, wg_ref[...],
                     preferred_element_type=jnp.float32) + bg_ref[...]  # (S, E)
    logits = logits - jnp.max(logits, axis=-1, keepdims=True)
    pe = jnp.exp(logits)
    probs = pe * pl.reciprocal(jnp.sum(pe, axis=-1, keepdims=True), approx=True)

    lane_idx = jax.lax.broadcasted_iota(jnp.int32, probs.shape, 1)   # (S, E)
    remaining = probs
    dense_w = jnp.zeros_like(probs)
    for _ in range(top_k):                    # static loop (top_k is tiny)
        m = jnp.max(remaining, axis=-1, keepdims=True)
        is_max = remaining == m
        # tie-break to the lowest expert index (matches torch.topk / lax.top_k)
        sel = jnp.min(jnp.where(is_max, lane_idx, E), axis=-1, keepdims=True)
        first = lane_idx == sel
        dense_w = dense_w + jnp.where(first, remaining, 0.0)
        remaining = jnp.where(first, -1.0, remaining)
    dense_w = dense_w / jnp.sum(dense_w, axis=-1, keepdims=True)     # renorm

    # --- experts (dense all-expert compute, static loop) + combine ----------
    # TODO(synk): for large num_experts switch to token-gather routing via
    # PrefetchScalarGridSpec; dense compute is fine at E=4 / top_k=2.
    acc = y_ln                                        # residual
    for e in range(E):
        h = jnp.dot(y_ln_bf, w1_ref[e],
                    preferred_element_type=jnp.float32) + b1_ref[e]
        h = jnp.maximum(h, 0.0)
        eo = jnp.dot(h.astype(jnp.bfloat16), w2_ref[e],
                     preferred_element_type=jnp.float32) + b2_ref[e]  # (S, D)
        acc = acc + dense_w[:, e:e + 1] * eo

    # --- residual + LN2 ------------------------------------------------------
    mu2 = jnp.mean(acc, axis=-1, keepdims=True)
    var2 = jnp.mean((acc - mu2) ** 2, axis=-1, keepdims=True)
    o_ref[0] = ((acc - mu2) * jax.lax.rsqrt(var2 + 1e-5)
                * ln2_g_ref[...] + ln2_b_ref[...])


def pallas_encoder_layer(x, p, *, num_heads, top_k):
    B, S, D = x.shape
    E, _, Hd = p["w1"].shape
    c2 = lambda shape: pl.BlockSpec(shape, lambda b: (0, 0))
    c3 = lambda shape: pl.BlockSpec(shape, lambda b: (0, 0, 0))
    # Note: for v7x with odd/small B, an additional "parallel" S-tile grid axis
    # would keep both TensorCores fed; B=2 here is already balanced.
    return pl.pallas_call(
        functools.partial(_encoder_layer_kernel, num_heads, top_k),
        out_shape=jax.ShapeDtypeStruct((B, S, D), jnp.float32),
        grid=(B,),
        in_specs=[
            pl.BlockSpec((1, S, D), lambda b: (b, 0, 0)),   # x
            c2((D, 3 * D)),                                 # wqkv  (bf16)
            c2((1, 3 * D)),                                 # bqkv
            c2((D, D)),                                     # wo    (bf16)
            c2((1, D)),                                     # bo
            c2((D, E)),                                     # wg    (bf16)
            c2((1, E)),                                     # bg
            c2((1, D)),                                     # ln1_g
            c2((1, D)),                                     # ln1_b
            c3((E, D, Hd)),                                 # w1    (bf16)
            c3((E, 1, Hd)),                                 # b1
            c3((E, Hd, D)),                                 # w2    (bf16)
            c3((E, 1, D)),                                  # b2
            c2((1, D)),                                     # ln2_g
            c2((1, D)),                                     # ln2_b
        ],
        out_specs=pl.BlockSpec((1, S, D), lambda b: (b, 0, 0)),
        compiler_params=pltpu.CompilerParams(
            dimension_semantics=("parallel",),
            vmem_limit_bytes=_vmem_limit_bytes()),
    )(x, p["wqkv"], p["bqkv"], p["wo"], p["bo"], p["wg"], p["bg"],
      p["ln1_g"], p["ln1_b"], p["w1"], p["b1"], p["w2"], p["b2"],
      p["ln2_g"], p["ln2_b"])


# ----------------------------------------------------------------------------
# Tiled linear (final vocab projection).  bf16 operands, f32 accumulator,
# pad-to-tile for non-divisible dims (never full-extent fallback on big dims).
# ----------------------------------------------------------------------------

def _matmul_kernel(x_ref, w_ref, b_ref, o_ref, acc_ref):
    @pl.when(pl.program_id(2) == 0)
    def _():
        acc_ref[...] = jnp.zeros_like(acc_ref)

    acc_ref[...] += jnp.dot(x_ref[...], w_ref[...],
                            preferred_element_type=jnp.float32)

    @pl.when(pl.program_id(2) == pl.num_programs(2) - 1)
    def _():
        o_ref[...] = acc_ref[...] + b_ref[...]


def pallas_linear(x, w_bf16, b, *, tm=256, tn=256, tk=512):
    M, K = x.shape
    N = w_bf16.shape[1]

    def fit(dim, tile):
        # Small dims: single full-extent block (legal).  Large dims: pad to a
        # multiple of the (8/128-aligned) tile so blocks stay VMEM-sized.
        if dim <= tile:
            return dim, dim
        return _round_up(dim, tile), tile

    Mp, tm = fit(M, tm)
    Np, tn = fit(N, tn)
    Kp, tk = fit(K, tk)

    xb = x.astype(jnp.bfloat16)
    wb = w_bf16
    bb = b.reshape(1, N)
    if (Mp, Kp) != (M, K):
        xb = jnp.pad(xb, ((0, Mp - M), (0, Kp - K)))
    if (Kp, Np) != (K, N):
        wb = jnp.pad(wb, ((0, Kp - K), (0, Np - N)))
    if Np != N:
        bb = jnp.pad(bb, ((0, 0), (0, Np - N)))

    out = pl.pallas_call(
        _matmul_kernel,
        out_shape=jax.ShapeDtypeStruct((Mp, Np), jnp.float32),
        grid=(Mp // tm, Np // tn, Kp // tk),
        in_specs=[
            pl.BlockSpec((tm, tk), lambda i, j, k: (i, k)),
            pl.BlockSpec((tk, tn), lambda i, j, k: (k, j)),
            pl.BlockSpec((1, tn), lambda i, j, k: (0, j)),
        ],
        out_specs=pl.BlockSpec((tm, tn), lambda i, j, k: (i, j)),
        scratch_shapes=[pltpu.VMEM((tm, tn), jnp.float32)],
        compiler_params=pltpu.CompilerParams(
            dimension_semantics=("parallel", "parallel", "arbitrary"),
            vmem_limit_bytes=_vmem_limit_bytes()),
    )(xb, wb, bb)
    if (Mp, Np) != (M, N):
        out = out[:M, :N]
    return out


# ----------------------------------------------------------------------------
# Parameter init + forward glue
# ----------------------------------------------------------------------------

def init_params(key, *, model_dim, num_heads, num_experts, hidden_dim,
                num_layers, vocab_size, max_seq_len):
    keys = jax.random.split(key, 4 + num_layers)

    def dense(k, fan_in, fan_out):
        kw, kb = jax.random.split(k)
        lim = 1.0 / math.sqrt(fan_in)
        w = jax.random.uniform(kw, (fan_in, fan_out), jnp.float32, -lim, lim)
        b = jax.random.uniform(kb, (fan_out,), jnp.float32, -lim, lim)
        return w, b

    params = {
        "emb": 0.02 * jax.random.normal(keys[0], (vocab_size, model_dim), jnp.float32),
        "pos": jnp.zeros((1, max_seq_len, model_dim), jnp.float32),
        "layers": [],
    }
    w_out, b_out = dense(keys[1], model_dim, vocab_size)
    params["w_out"] = w_out.astype(jnp.bfloat16)     # bf16 weights, f32 bias
    params["b_out"] = b_out

    head_dim = model_dim // num_heads
    q_scale = 1.0 / math.sqrt(head_dim)
    D = model_dim

    for li in range(num_layers):
        lk = jax.random.split(keys[4 + li], 10)
        layer = {}
        wq, bq = dense(lk[0], D, D)
        wk, bk = dense(lk[1], D, D)
        wv, bv = dense(lk[2], D, D)
        # Fold the attention 1/sqrt(head_dim) scale into the Q projection.
        wq, bq = wq * q_scale, bq * q_scale
        layer["wqkv"] = jnp.concatenate([wq, wk, wv], axis=1).astype(jnp.bfloat16)
        layer["bqkv"] = jnp.concatenate([bq, bk, bv]).reshape(1, 3 * D)
        wo, bo = dense(lk[3], D, D)
        layer["wo"] = wo.astype(jnp.bfloat16)
        layer["bo"] = bo.reshape(1, D)
        layer["ln1_g"] = jnp.ones((1, D), jnp.float32)
        layer["ln1_b"] = jnp.zeros((1, D), jnp.float32)
        layer["ln2_g"] = jnp.ones((1, D), jnp.float32)
        layer["ln2_b"] = jnp.zeros((1, D), jnp.float32)
        wg, bg = dense(lk[4], D, num_experts)
        layer["wg"] = wg.astype(jnp.bfloat16)
        layer["bg"] = bg.reshape(1, num_experts)
        w1s, b1s, w2s, b2s = [], [], [], []
        for e in range(num_experts):
            ek = jax.random.fold_in(lk[5], e)
            ek1, ek2 = jax.random.split(ek)
            w1, b1 = dense(ek1, D, hidden_dim)
            w2, b2 = dense(ek2, hidden_dim, D)
            w1s.append(w1); b1s.append(b1); w2s.append(w2); b2s.append(b2)
        layer["w1"] = jnp.stack(w1s).astype(jnp.bfloat16)                # (E, D, Hd)
        layer["b1"] = jnp.stack(b1s).reshape(num_experts, 1, hidden_dim)  # (E, 1, Hd)
        layer["w2"] = jnp.stack(w2s).astype(jnp.bfloat16)                # (E, Hd, D)
        layer["b2"] = jnp.stack(b2s).reshape(num_experts, 1, D)          # (E, 1, D)
        params["layers"].append(layer)
    return params


def model_forward(params, src, *, num_heads, top_k):
    # src: (B, S) int32 token ids
    B, S = src.shape
    D = params["emb"].shape[1]
    # Embedding gather + positional add stay in XLA (tiny, no Pallas win).
    x = params["emb"][src] + params["pos"][:, :S, :]             # (B, S, D)
    for layer in params["layers"]:
        x = pallas_encoder_layer(x, layer, num_heads=num_heads, top_k=top_k)
    M = B * S
    logits = pallas_linear(x.reshape(M, D), params["w_out"], params["b_out"])
    return logits.reshape(B, S, -1)                              # (B, S, vocab)


# ----------------------------------------------------------------------------
# Main
# ----------------------------------------------------------------------------

if __name__ == "__main__":
    # Small config consistent with the module's constructor.
    model_dim = 32
    num_heads = 4
    num_experts = 4
    hidden_dim = 64
    num_layers = 2
    vocab_size = 64
    max_seq_len = 16
    top_k = 2

    batch = 2
    seq = 8

    key = jax.random.PRNGKey(0)
    pkey, dkey = jax.random.split(key)

    params = init_params(
        pkey,
        model_dim=model_dim, num_heads=num_heads, num_experts=num_experts,
        hidden_dim=hidden_dim, num_layers=num_layers, vocab_size=vocab_size,
        max_seq_len=max_seq_len,
    )

    src = jax.random.randint(dkey, (batch, seq), 0, vocab_size, dtype=jnp.int32)

    fwd = jax.jit(functools.partial(model_forward,
                                    num_heads=num_heads, top_k=top_k))
    out = fwd(params, src)
    out = jax.block_until_ready(out)

    assert out.shape == (batch, seq, vocab_size), out.shape
    assert jnp.all(jnp.isfinite(out))
    print("KERNEL_OK")
</pallas_src>

<mosaic_0001>
module attributes {stable_mosaic.version = 11 : i64} {
  func.func @_matmul_kernel(%arg0: i32, %arg1: i32, %arg2: i32, %arg3: memref<16x32xbf16, #tpu.memory_space<vmem>>, %arg4: memref<32x64xbf16, #tpu.memory_space<vmem>>, %arg5: memref<1x64xf32, #tpu.memory_space<vmem>>, %arg6: memref<16x64xf32, #tpu.memory_space<vmem>>, %arg7: memref<16x64xf32, #tpu.memory_space<vmem>>) attributes {dimension_semantics = [#tpu.dimension_semantics<parallel>, #tpu.dimension_semantics<parallel>, #tpu.dimension_semantics<arbitrary>], iteration_bounds = array<i64: 1, 1, 1>, scalar_prefetch = 0 : i64, scratch_operands = 1 : i64, tpu.core_type = #tpu.core_type<tc>, window_params = [{transform_indices = @transform_0, window_bounds = array<i64: 16, 32>}, {transform_indices = @transform_1, window_bounds = array<i64: 32, 64>}, {transform_indices = @transform_2, window_bounds = array<i64: 1, 64>}, {transform_indices = @transform_3, window_bounds = array<i64: 16, 64>}]} {
    %c0_i32 = arith.constant 0 : i32
    %0 = arith.cmpi eq, %arg2, %c0_i32 : i32
    %1 = arith.extui %0 : i1 to i32
    %c0_i32_0 = arith.constant 0 : i32
    %2 = arith.cmpi ne, %1, %c0_i32_0 : i32
    scf.if %2 {
      %cst_10 = arith.constant 0.000000e+00 : f32
      %12 = vector.broadcast %cst_10 : f32 to vector<16x64xf32>
      %c0_11 = arith.constant 0 : index
      %c0_12 = arith.constant 0 : index
      %13 = vector.load %arg7[%c0_11, %c0_12] : memref<16x64xf32, #tpu.memory_space<vmem>>, vector<16x64xf32>
      tpu.vector_store %arg7[%c0_11, %c0_12], %12 {strides = array<i32>} : memref<16x64xf32, #tpu.memory_space<vmem>>, vector<16x64xf32>,
    } else {
    }
    %c0 = arith.constant 0 : index
    %c0_1 = arith.constant 0 : index
    %3 = vector.load %arg7[%c0, %c0_1] : memref<16x64xf32, #tpu.memory_space<vmem>>, vector<16x64xf32>
    %c0_2 = arith.constant 0 : index
    %c0_3 = arith.constant 0 : index
    %4 = vector.load %arg3[%c0_2, %c0_3] : memref<16x32xbf16, #tpu.memory_space<vmem>>, vector<16x32xbf16>
    %c0_4 = arith.constant 0 : index
    %c0_5 = arith.constant 0 : index
    %5 = vector.load %arg4[%c0_4, %c0_5] : memref<32x64xbf16, #tpu.memory_space<vmem>>, vector<32x64xbf16>
    %cst = arith.constant dense<0.000000e+00> : vector<16x64xf32>
    %6 = tpu.matmul %4, %5, %cst {dimension_numbers = #tpu.dot_dimension_numbers<[1], [0], [0], [1], [0, 0, 1, 1], [], []>} : vector<16x32xbf16>, vector<32x64xbf16>, vector<16x64xf32> -> vector<16x64xf32>
    %7 = arith.addf %3, %6 : vector<16x64xf32>
    %c0_6 = arith.constant 0 : index
    %c0_7 = arith.constant 0 : index
    %8 = vector.load %arg7[%c0_6, %c0_7] : memref<16x64xf32, #tpu.memory_space<vmem>>, vector<16x64xf32>
    tpu.vector_store %arg7[%c0_6, %c0_7], %7 {strides = array<i32>} : memref<16x64xf32, #tpu.memory_space<vmem>>, vector<16x64xf32>,
    %c0_i32_8 = arith.constant 0 : i32
    %9 = arith.cmpi eq, %arg2, %c0_i32_8 : i32
    %10 = arith.extui %9 : i1 to i32
    %c0_i32_9 = arith.constant 0 : i32
    %11 = arith.cmpi ne, %10, %c0_i32_9 : i32
    scf.if %11 {
      %c0_10 = arith.constant 0 : index
      %c0_11 = arith.constant 0 : index
      %12 = vector.load %arg7[%c0_10, %c0_11] : memref<16x64xf32, #tpu.memory_space<vmem>>, vector<16x64xf32>
      %c0_12 = arith.constant 0 : index
      %c0_13 = arith.constant 0 : index
      %13 = vector.load %arg5[%c0_12, %c0_13] : memref<1x64xf32, #tpu.memory_space<vmem>>, vector<1x64xf32>
      %14 = vector.broadcast %13 : vector<1x64xf32> to vector<16x64xf32>
      %15 = arith.addf %12, %14 : vector<16x64xf32>
      %c0_14 = arith.constant 0 : index
      %c0_15 = arith.constant 0 : index
      %16 = vector.load %arg6[%c0_14, %c0_15] : memref<16x64xf32, #tpu.memory_space<vmem>>, vector<16x64xf32>
      tpu.vector_store %arg6[%c0_14, %c0_15], %15 {strides = array<i32>} : memref<16x64xf32, #tpu.memory_space<vmem>>, vector<16x64xf32>,
    } else {
    }
    return
  }
  func.func @transform_0(%arg0: i32, %arg1: i32, %arg2: i32) -> (i32, i32) {
    %c0_i32 = arith.constant 0 : i32
    return %arg0, %arg2 : i32, i32
  }
  func.func @transform_1(%arg0: i32, %arg1: i32, %arg2: i32) -> (i32, i32) {
    %c0_i32 = arith.constant 0 : i32
    return %arg2, %arg1 : i32, i32
  }
  func.func @transform_2(%arg0: i32, %arg1: i32, %arg2: i32) -> (i32, i32) {
    %c0_i32 = arith.constant 0 : i32
    %c0_i32_0 = arith.constant 0 : i32
    return %c0_i32, %arg1 : i32, i32
  }
  func.func @transform_3(%arg0: i32, %arg1: i32, %arg2: i32) -> (i32, i32) {
    %c0_i32 = arith.constant 0 : i32
    return %arg0, %arg1 : i32, i32
  }
}

module attributes {stable_mosaic.version = 11 : i64} {
  func.func @_encoder_layer_kernel(%arg0: i32, %arg1: memref<1x8x32xf32, #tpu.memory_space<vmem>>, %arg2: memref<32x96xbf16, #tpu.memory_space<vmem>>, %arg3: memref<1x96xf32, #tpu.memory_space<vmem>>, %arg4: memref<32x32xbf16, #tpu.memory_space<vmem>>, %arg5: memref<1x32xf32, #tpu.memory_space<vmem>>, %arg6: memref<32x4xbf16, #tpu.memory_space<vmem>>, %arg7: memref<1x4xf32, #tpu.memory_space<vmem>>, %arg8: memref<1x32xf32, #tpu.memory_space<vmem>>, %arg9: memref<1x32xf32, #tpu.memory_space<vmem>>, %arg10: memref<4x32x64xbf16, #tpu.memory_space<vmem>>, %arg11: memref<4x1x64xf32, #tpu.memory_space<vmem>>, %arg12: memref<4x64x32xbf16, #tpu.memory_space<vmem>>, %arg13: memref<4x1x32xf32, #tpu.memory_space<vmem>>, %arg14: memref<1x32xf32, #tpu.memory_space<vmem>>, %arg15: memref<1x32xf32, #tpu.memory_space<vmem>>, %arg16: memref<1x8x32xf32, #tpu.memory_space<vmem>>) attributes {dimension_semantics = [#tpu.dimension_semantics<parallel>], iteration_bounds = array<i64: 2>, scalar_prefetch = 0 : i64, scratch_operands = 0 : i64, tpu.core_type = #tpu.core_type<tc>, window_params = [{transform_indices = @transform_0, window_bounds = array<i64: 1, 8, 32>}, {pipeline_mode = #tpu.pipeline_mode<synchronous>, transform_indices = @transform_1, window_bounds = array<i64: 32, 96>}, {pipeline_mode = #tpu.pipeline_mode<synchronous>, transform_indices = @transform_2, window_bounds = array<i64: 1, 96>}, {pipeline_mode = #tpu.pipeline_mode<synchronous>, transform_indices = @transform_3, window_bounds = array<i64: 32, 32>}, {pipeline_mode = #tpu.pipeline_mode<synchronous>, transform_indices = @transform_4, window_bounds = array<i64: 1, 32>}, {pipeline_mode = #tpu.pipeline_mode<synchronous>, transform_indices = @transform_5, window_bounds = array<i64: 32, 4>}, {pipeline_mode = #tpu.pipeline_mode<synchronous>, transform_indices = @transform_6, window_bounds = array<i64: 1, 4>}, {pipeline_mode = #tpu.pipeline_mode<synchronous>, transform_indices = @transform_7, window_bounds = array<i64: 1, 32>}, {pipeline_mode = #tpu.pipeline_mode<synchronous>, transform_indices = @transform_8, window_bounds = array<i64: 1, 32>}, {pipeline_mode = #tpu.pipeline_mode<synchronous>, transform_indices = @transform_9, window_bounds = array<i64: 4, 32, 64>}, {pipeline_mode = #tpu.pipeline_mode<synchronous>, transform_indices = @transform_10, window_bounds = array<i64: 4, 1, 64>}, {pipeline_mode = #tpu.pipeline_mode<synchronous>, transform_indices = @transform_11, window_bounds = array<i64: 4, 64, 32>}, {pipeline_mode = #tpu.pipeline_mode<synchronous>, transform_indices = @transform_12, window_bounds = array<i64: 4, 1, 32>}, {pipeline_mode = #tpu.pipeline_mode<synchronous>, transform_indices = @transform_13, window_bounds = array<i64: 1, 32>}, {pipeline_mode = #tpu.pipeline_mode<synchronous>, transform_indices = @transform_14, window_bounds = array<i64: 1, 32>}, {transform_indices = @transform_15, window_bounds = array<i64: 1, 8, 32>}]} {
    %c0 = arith.constant 0 : index
    %c0_0 = arith.constant 0 : index
    %c0_1 = arith.constant 0 : index
    %0 = vector.load %arg1[%c0, %c0_0, %c0_1] : memref<1x8x32xf32, #tpu.memory_space<vmem>>, vector<1x8x32xf32>
    %1 = vector.shape_cast %0 : vector<1x8x32xf32> to vector<8x32xf32>
    %2 = arith.truncf %1 : vector<8x32xf32> to vector<8x32xbf16>
    %c0_2 = arith.constant 0 : index
    %c0_3 = arith.constant 0 : index
    %3 = vector.load %arg2[%c0_2, %c0_3] : memref<32x96xbf16, #tpu.memory_space<vmem>>, vector<32x96xbf16>
    %cst = arith.constant dense<0.000000e+00> : vector<8x96xf32>
    %4 = tpu.matmul %2, %3, %cst {dimension_numbers = #tpu.dot_dimension_numbers<[1], [0], [0], [1], [0, 0, 1, 1], [], []>} : vector<8x32xbf16>, vector<32x96xbf16>, vector<8x96xf32> -> vector<8x96xf32>
    %c0_4 = arith.constant 0 : index
    %c0_5 = arith.constant 0 : index
    %5 = vector.load %arg3[%c0_4, %c0_5] : memref<1x96xf32, #tpu.memory_space<vmem>>, vector<1x96xf32>
    %6 = vector.broadcast %5 : vector<1x96xf32> to vector<8x96xf32>
    %7 = arith.addf %4, %6 : vector<8x96xf32>
    %8 = vector.shape_cast %7 : vector<8x96xf32> to vector<8x12x8xf32>
    %9 = tpu.transpose %8, [1, 0, 2] : vector<8x12x8xf32> -> vector<12x8x8xf32>
    %10 = vector.extract_strided_slice %9 {offsets = [0, 0, 0], sizes = [4, 8, 8], strides = [1, 1, 1]} : vector<12x8x8xf32> to vector<4x8x8xf32>
    %11 = arith.truncf %10 : vector<4x8x8xf32> to vector<4x8x8xbf16>
    %12 = vector.extract_strided_slice %9 {offsets = [4, 0, 0], sizes = [4, 8, 8], strides = [1, 1, 1]} : vector<12x8x8xf32> to vector<4x8x8xf32>
    %13 = arith.truncf %12 : vector<4x8x8xf32> to vector<4x8x8xbf16>
    %14 = vector.extract_strided_slice %9 {offsets = [8, 0, 0], sizes = [4, 8, 8], strides = [1, 1, 1]} : vector<12x8x8xf32> to vector<4x8x8xf32>
    %15 = arith.truncf %14 : vector<4x8x8xf32> to vector<4x8x8xbf16>
    "tpu.trace_start"() <{level = 10 : i32, message = "hqd,hkd->hqk"}> : () -> ()
    %cst_6 = arith.constant dense<0.000000e+00> : vector<4x8x8xf32>
    %16 = tpu.matmul %11, %13, %cst_6 {dimension_numbers = #tpu.dot_dimension_numbers<[2], [2], [1], [1], [0, 0, 0, 1, 1, 1], [0], [0]>} : vector<4x8x8xbf16>, vector<4x8x8xbf16>, vector<4x8x8xf32> -> vector<4x8x8xf32>
    "tpu.trace_stop"() : () -> ()
    %cst_7 = arith.constant dense<0xFF800000> : vector<4x8xf32>
    %17 = vector.multi_reduction <maximumf>, %16, %cst_7 [2] : vector<4x8x8xf32> to vector<4x8xf32>
    %18 = vector.shape_cast %17 : vector<4x8xf32> to vector<4x8x1xf32>
    %19 = vector.broadcast %18 : vector<4x8x1xf32> to vector<4x8x8xf32>
    %20 = arith.subf %16, %19 : vector<4x8x8xf32>
    %21 = math.exp %20 : vector<4x8x8xf32>
    %cst_8 = arith.constant dense<0.000000e+00> : vector<4x8xf32>
    %22 = vector.multi_reduction <add>, %21, %cst_8 [2] : vector<4x8x8xf32> to vector<4x8xf32>
    %23 = vector.shape_cast %22 : vector<4x8xf32> to vector<4x8x1xf32>
    %24 = tpu.reciprocal %23 {approx = true} : vector<4x8x1xf32> -> vector<4x8x1xf32>
    %25 = vector.broadcast %24 : vector<4x8x1xf32> to vector<4x8x8xf32>
    %26 = arith.mulf %21, %25 : vector<4x8x8xf32>
    %27 = arith.truncf %26 : vector<4x8x8xf32> to vector<4x8x8xbf16>
    "tpu.trace_start"() <{level = 10 : i32, message = "hqk,hkd->hqd"}> : () -> ()
    %cst_9 = arith.constant dense<0.000000e+00> : vector<4x8x8xf32>
    %28 = tpu.matmul %27, %15, %cst_9 {dimension_numbers = #tpu.dot_dimension_numbers<[2], [1], [1], [2], [0, 0, 0, 1, 1, 2], [0], [0]>} : vector<4x8x8xbf16>, vector<4x8x8xbf16>, vector<4x8x8xf32> -> vector<4x8x8xf32>
    "tpu.trace_stop"() : () -> ()
    %29 = tpu.transpose %28, [1, 0, 2] : vector<4x8x8xf32> -> vector<8x4x8xf32>
    %30 = vector.shape_cast %29 : vector<8x4x8xf32> to vector<8x32xf32>
    %31 = arith.truncf %30 : vector<8x32xf32> to vector<8x32xbf16>
    %c0_10 = arith.constant 0 : index
    %c0_11 = arith.constant 0 : index
    %32 = vector.load %arg4[%c0_10, %c0_11] : memref<32x32xbf16, #tpu.memory_space<vmem>>, vector<32x32xbf16>
    %cst_12 = arith.constant dense<0.000000e+00> : vector<8x32xf32>
    %33 = tpu.matmul %31, %32, %cst_12 {dimension_numbers = #tpu.dot_dimension_numbers<[1], [0], [0], [1], [0, 0, 1, 1], [], []>} : vector<8x32xbf16>, vector<32x32xbf16>, vector<8x32xf32> -> vector<8x32xf32>
    %c0_13 = arith.constant 0 : index
    %c0_14 = arith.constant 0 : index
    %34 = vector.load %arg5[%c0_13, %c0_14] : memref<1x32xf32, #tpu.memory_space<vmem>>, vector<1x32xf32>
    %35 = vector.broadcast %34 : vector<1x32xf32> to vector<8x32xf32>
    %36 = arith.addf %33, %35 : vector<8x32xf32>
    %37 = arith.addf %1, %36 : vector<8x32xf32>
    %cst_15 = arith.constant dense<0.000000e+00> : vector<8xf32>
    %38 = vector.multi_reduction <add>, %37, %cst_15 [1] : vector<8x32xf32> to vector<8xf32>
    %39 = vector.shape_cast %38 : vector<8xf32> to vector<8x1xf32>
    %cst_16 = arith.constant 3.200000e+01 : f32
    %40 = vector.broadcast %cst_16 : f32 to vector<8x1xf32>
    %41 = arith.divf %39, %40 : vector<8x1xf32>
    %42 = vector.broadcast %41 : vector<8x1xf32> to vector<8x32xf32>
    %43 = arith.subf %37, %42 : vector<8x32xf32>
    %44 = arith.mulf %43, %43 : vector<8x32xf32>
    %cst_17 = arith.constant dense<0.000000e+00> : vector<8xf32>
    %45 = vector.multi_reduction <add>, %44, %cst_17 [1] : vector<8x32xf32> to vector<8xf32>
    %46 = vector.shape_cast %45 : vector<8xf32> to vector<8x1xf32>
    %cst_18 = arith.constant 3.200000e+01 : f32
    %47 = vector.broadcast %cst_18 : f32 to vector<8x1xf32>
    %48 = arith.divf %46, %47 : vector<8x1xf32>
    %49 = vector.broadcast %41 : vector<8x1xf32> to vector<8x32xf32>
    %50 = arith.subf %37, %49 : vector<8x32xf32>
    %cst_19 = arith.constant 9.99999974E-6 : f32
    %51 = vector.broadcast %cst_19 : f32 to vector<8x1xf32>
    %52 = arith.addf %48, %51 : vector<8x1xf32>
    %53 = math.rsqrt %52 : vector<8x1xf32>
    %54 = vector.broadcast %53 : vector<8x1xf32> to vector<8x32xf32>
    %55 = arith.mulf %50, %54 : vector<8x32xf32>
    %c0_20 = arith.constant 0 : index
    %c0_21 = arith.constant 0 : index
    %56 = vector.load %arg8[%c0_20, %c0_21] : memref<1x32xf32, #tpu.memory_space<vmem>>, vector<1x32xf32>
    %57 = vector.broadcast %56 : vector<1x32xf32> to vector<8x32xf32>
    %58 = arith.mulf %55, %57 : vector<8x32xf32>
    %c0_22 = arith.constant 0 : index
    %c0_23 = arith.constant 0 : index
    %59 = vector.load %arg9[%c0_22, %c0_23] : memref<1x32xf32, #tpu.memory_space<vmem>>, vector<1x32xf32>
    %60 = vector.broadcast %59 : vector<1x32xf32> to vector<8x32xf32>
    %61 = arith.addf %58, %60 : vector<8x32xf32>
    %62 = arith.truncf %61 : vector<8x32xf32> to vector<8x32xbf16>
    %c0_24 = arith.constant 0 : index
    %c0_25 = arith.constant 0 : index
    %63 = vector.load %arg6[%c0_24, %c0_25] : memref<32x4xbf16, #tpu.memory_space<vmem>>, vector<32x4xbf16>
    %cst_26 = arith.constant dense<0.000000e+00> : vector<8x4xf32>
    %64 = tpu.matmul %62, %63, %cst_26 {dimension_numbers = #tpu.dot_dimension_numbers<[1], [0], [0], [1], [0, 0, 1, 1], [], []>} : vector<8x32xbf16>, vector<32x4xbf16>, vector<8x4xf32> -> vector<8x4xf32>
    %c0_27 = arith.constant 0 : index
    %c0_28 = arith.constant 0 : index
    %65 = vector.load %arg7[%c0_27, %c0_28] : memref<1x4xf32, #tpu.memory_space<vmem>>, vector<1x4xf32>
    %66 = vector.broadcast %65 : vector<1x4xf32> to vector<8x4xf32>
    %67 = arith.addf %64, %66 : vector<8x4xf32>
    %cst_29 = arith.constant dense<0xFF800000> : vector<8xf32>
    %68 = vector.multi_reduction <maximumf>, %67, %cst_29 [1] : vector<8x4xf32> to vector<8xf32>
    %69 = vector.shape_cast %68 : vector<8xf32> to vector<8x1xf32>
    %70 = vector.broadcast %69 : vector<8x1xf32> to vector<8x4xf32>
    %71 = arith.subf %67, %70 : vector<8x4xf32>
    %72 = math.exp %71 : vector<8x4xf32>
    %cst_30 = arith.constant dense<0.000000e+00> : vector<8xf32>
    %73 = vector.multi_reduction <add>, %72, %cst_30 [1] : vector<8x4xf32> to vector<8xf32>
    %74 = vector.shape_cast %73 : vector<8xf32> to vector<8x1xf32>
    %75 = tpu.reciprocal %74 {approx = true} : vector<8x1xf32> -> vector<8x1xf32>
    %76 = vector.broadcast %75 : vector<8x1xf32> to vector<8x4xf32>
    %77 = arith.mulf %72, %76 : vector<8x4xf32>
    %78 = tpu.iota {dimensions = array<i32: 1>} : vector<8x4xi32>
    %cst_31 = arith.constant 0.000000e+00 : f32
    %79 = vector.broadcast %cst_31 : f32 to vector<8x4xf32>
    %cst_32 = arith.constant dense<0xFF800000> : vector<8xf32>
    %80 = vector.multi_reduction <maximumf>, %77, %cst_32 [1] : vector<8x4xf32> to vector<8xf32>
    %81 = vector.shape_cast %80 : vector<8xf32> to vector<8x1xf32>
    %82 = vector.broadcast %81 : vector<8x1xf32> to vector<8x4xf32>
    %83 = arith.cmpf oeq, %77, %82 : vector<8x4xf32>
    %c4_i32 = arith.constant 4 : i32
    %84 = vector.broadcast %c4_i32 : i32 to vector<8x4xi32>
    %85 = arith.select %83, %78, %84 : vector<8x4xi1>, vector<8x4xi32>
    %cst_33 = arith.constant dense<2147483647> : vector<8xi32>
    %86 = vector.multi_reduction <minsi>, %85, %cst_33 [1] : vector<8x4xi32> to vector<8xi32>
    %87 = vector.shape_cast %86 : vector<8xi32> to vector<8x1xi32>
    %88 = vector.broadcast %87 : vector<8x1xi32> to vector<8x4xi32>
    %89 = arith.cmpi eq, %78, %88 : vector<8x4xi32>
    %cst_34 = arith.constant 0.000000e+00 : f32
    %90 = vector.broadcast %cst_34 : f32 to vector<8x4xf32>
    %91 = arith.select %89, %77, %90 : vector<8x4xi1>, vector<8x4xf32>
    %92 = arith.addf %79, %91 : vector<8x4xf32>
    %cst_35 = arith.constant -1.000000e+00 : f32
    %93 = vector.broadcast %cst_35 : f32 to vector<8x4xf32>
    %94 = arith.select %89, %93, %77 : vector<8x4xi1>, vector<8x4xf32>
    %cst_36 = arith.constant dense<0xFF800000> : vector<8xf32>
    %95 = vector.multi_reduction <maximumf>, %94, %cst_36 [1] : vector<8x4xf32> to vector<8xf32>
    %96 = vector.shape_cast %95 : vector<8xf32> to vector<8x1xf32>
    %97 = vector.broadcast %96 : vector<8x1xf32> to vector<8x4xf32>
    %98 = arith.cmpf oeq, %94, %97 : vector<8x4xf32>
    %c4_i32_37 = arith.constant 4 : i32
    %99 = vector.broadcast %c4_i32_37 : i32 to vector<8x4xi32>
    %100 = arith.select %98, %78, %99 : vector<8x4xi1>, vector<8x4xi32>
    %cst_38 = arith.constant dense<2147483647> : vector<8xi32>
    %101 = vector.multi_reduction <minsi>, %100, %cst_38 [1] : vector<8x4xi32> to vector<8xi32>
    %102 = vector.shape_cast %101 : vector<8xi32> to vector<8x1xi32>
    %103 = vector.broadcast %102 : vector<8x1xi32> to vector<8x4xi32>
    %104 = arith.cmpi eq, %78, %103 : vector<8x4xi32>
    %cst_39 = arith.constant 0.000000e+00 : f32
    %105 = vector.broadcast %cst_39 : f32 to vector<8x4xf32>
    %106 = arith.select %104, %94, %105 : vector<8x4xi1>, vector<8x4xf32>
    %107 = arith.addf %92, %106 : vector<8x4xf32>
    %cst_40 = arith.constant dense<0.000000e+00> : vector<8xf32>
    %108 = vector.multi_reduction <add>, %107, %cst_40 [1] : vector<8x4xf32> to vector<8xf32>
    %109 = vector.shape_cast %108 : vector<8xf32> to vector<8x1xf32>
    %110 = vector.broadcast %109 : vector<8x1xf32> to vector<8x4xf32>
    %111 = arith.divf %107, %110 : vector<8x4xf32>
    %c0_41 = arith.constant 0 : index
    %c0_42 = arith.constant 0 : index
    %c0_43 = arith.constant 0 : index
    %112 = vector.load %arg10[%c0_41, %c0_42, %c0_43] : memref<4x32x64xbf16, #tpu.memory_space<vmem>>, vector<1x32x64xbf16>
    %113 = vector.shape_cast %112 : vector<1x32x64xbf16> to vector<32x64xbf16>
    %cst_44 = arith.constant dense<0.000000e+00> : vector<8x64xf32>
    %114 = tpu.matmul %62, %113, %cst_44 {dimension_numbers = #tpu.dot_dimension_numbers<[1], [0], [0], [1], [0, 0, 1, 1], [], []>} : vector<8x32xbf16>, vector<32x64xbf16>, vector<8x64xf32> -> vector<8x64xf32>
    %c0_45 = arith.constant 0 : index
    %c0_46 = arith.constant 0 : index
    %c0_47 = arith.constant 0 : index
    %115 = vector.load %arg11[%c0_45, %c0_46, %c0_47] : memref<4x1x64xf32, #tpu.memory_space<vmem>>, vector<1x1x64xf32>
    %116 = vector.shape_cast %115 : vector<1x1x64xf32> to vector<1x64xf32>
    %117 = vector.broadcast %116 : vector<1x64xf32> to vector<8x64xf32>
    %118 = arith.addf %114, %117 : vector<8x64xf32>
    %cst_48 = arith.constant 0.000000e+00 : f32
    %119 = vector.broadcast %cst_48 : f32 to vector<8x64xf32>
    %120 = arith.maximumf %118, %119 : vector<8x64xf32>
    %121 = arith.truncf %120 : vector<8x64xf32> to vector<8x64xbf16>
    %c0_49 = arith.constant 0 : index
    %c0_50 = arith.constant 0 : index
    %c0_51 = arith.constant 0 : index
    %122 = vector.load %arg12[%c0_49, %c0_50, %c0_51] : memref<4x64x32xbf16, #tpu.memory_space<vmem>>, vector<1x64x32xbf16>
    %123 = vector.shape_cast %122 : vector<1x64x32xbf16> to vector<64x32xbf16>
    %cst_52 = arith.constant dense<0.000000e+00> : vector<8x32xf32>
    %124 = tpu.matmul %121, %123, %cst_52 {dimension_numbers = #tpu.dot_dimension_numbers<[1], [0], [0], [1], [0, 0, 1, 1], [], []>} : vector<8x64xbf16>, vector<64x32xbf16>, vector<8x32xf32> -> vector<8x32xf32>
    %c0_53 = arith.constant 0 : index
    %c0_54 = arith.constant 0 : index
    %c0_55 = arith.constant 0 : index
    %125 = vector.load %arg13[%c0_53, %c0_54, %c0_55] : memref<4x1x32xf32, #tpu.memory_space<vmem>>, vector<1x1x32xf32>
    %126 = vector.shape_cast %125 : vector<1x1x32xf32> to vector<1x32xf32>
    %127 = vector.broadcast %126 : vector<1x32xf32> to vector<8x32xf32>
    %128 = arith.addf %124, %127 : vector<8x32xf32>
    %129 = vector.extract_strided_slice %111 {offsets = [0, 0], sizes = [8, 1], strides = [1, 1]} : vector<8x4xf32> to vector<8x1xf32>
    %130 = vector.broadcast %129 : vector<8x1xf32> to vector<8x32xf32>
    %131 = arith.mulf %130, %128 : vector<8x32xf32>
    %132 = arith.addf %61, %131 : vector<8x32xf32>
    %c1 = arith.constant 1 : index
    %c0_56 = arith.constant 0 : index
    %c0_57 = arith.constant 0 : index
    %133 = vector.load %arg10[%c1, %c0_56, %c0_57] : memref<4x32x64xbf16, #tpu.memory_space<vmem>>, vector<1x32x64xbf16>
    %134 = vector.shape_cast %133 : vector<1x32x64xbf16> to vector<32x64xbf16>
    %cst_58 = arith.constant dense<0.000000e+00> : vector<8x64xf32>
    %135 = tpu.matmul %62, %134, %cst_58 {dimension_numbers = #tpu.dot_dimension_numbers<[1], [0], [0], [1], [0, 0, 1, 1], [], []>} : vector<8x32xbf16>, vector<32x64xbf16>, vector<8x64xf32> -> vector<8x64xf32>
    %c1_59 = arith.constant 1 : index
    %c0_60 = arith.constant 0 : index
    %c0_61 = arith.constant 0 : index
    %136 = vector.load %arg11[%c1_59, %c0_60, %c0_61] : memref<4x1x64xf32, #tpu.memory_space<vmem>>, vector<1x1x64xf32>
    %137 = vector.shape_cast %136 : vector<1x1x64xf32> to vector<1x64xf32>
    %138 = vector.broadcast %137 : vector<1x64xf32> to vector<8x64xf32>
    %139 = arith.addf %135, %138 : vector<8x64xf32>
    %cst_62 = arith.constant 0.000000e+00 : f32
    %140 = vector.broadcast %cst_62 : f32 to vector<8x64xf32>
    %141 = arith.maximumf %139, %140 : vector<8x64xf32>
    %142 = arith.truncf %141 : vector<8x64xf32> to vector<8x64xbf16>
    %c1_63 = arith.constant 1 : index
    %c0_64 = arith.constant 0 : index
    %c0_65 = arith.constant 0 : index
    %143 = vector.load %arg12[%c1_63, %c0_64, %c0_65] : memref<4x64x32xbf16, #tpu.memory_space<vmem>>, vector<1x64x32xbf16>
    %144 = vector.shape_cast %143 : vector<1x64x32xbf16> to vector<64x32xbf16>
    %cst_66 = arith.constant dense<0.000000e+00> : vector<8x32xf32>
    %145 = tpu.matmul %142, %144, %cst_66 {dimension_numbers = #tpu.dot_dimension_numbers<[1], [0], [0], [1], [0, 0, 1, 1], [], []>} : vector<8x64xbf16>, vector<64x32xbf16>, vector<8x32xf32> -> vector<8x32xf32>
    %c1_67 = arith.constant 1 : index
    %c0_68 = arith.constant 0 : index
    %c0_69 = arith.constant 0 : index
    %146 = vector.load %arg13[%c1_67, %c0_68, %c0_69] : memref<4x1x32xf32, #tpu.memory_space<vmem>>, vector<1x1x32xf32>
    %147 = vector.shape_cast %146 : vector<1x1x32xf32> to vector<1x32xf32>
    %148 = vector.broadcast %147 : vector<1x32xf32> to vector<8x32xf32>
    %149 = arith.addf %145, %148 : vector<8x32xf32>
    %150 = vector.extract_strided_slice %111 {offsets = [0, 1], sizes = [8, 1], strides = [1, 1]} : vector<8x4xf32> to vector<8x1xf32>
    %151 = vector.broadcast %150 : vector<8x1xf32> to vector<8x32xf32>
    %152 = arith.mulf %151, %149 : vector<8x32xf32>
    %153 = arith.addf %132, %152 : vector<8x32xf32>
    %c2 = arith.constant 2 : index
    %c0_70 = arith.constant 0 : index
    %c0_71 = arith.constant 0 : index
    %154 = vector.load %arg10[%c2, %c0_70, %c0_71] : memref<4x32x64xbf16, #tpu.memory_space<vmem>>, vector<1x32x64xbf16>
    %155 = vector.shape_cast %154 : vector<1x32x64xbf16> to vector<32x64xbf16>
    %cst_72 = arith.constant dense<0.000000e+00> : vector<8x64xf32>
    %156 = tpu.matmul %62, %155, %cst_72 {dimension_numbers = #tpu.dot_dimension_numbers<[1], [0], [0], [1], [0, 0, 1, 1], [], []>} : vector<8x32xbf16>, vector<32x64xbf16>, vector<8x64xf32> -> vector<8x64xf32>
    %c2_73 = arith.constant 2 : index
    %c0_74 = arith.constant 0 : index
    %c0_75 = arith.constant 0 : index
    %157 = vector.load %arg11[%c2_73, %c0_74, %c0_75] : memref<4x1x64xf32, #tpu.memory_space<vmem>>, vector<1x1x64xf32>
    %158 = vector.shape_cast %157 : vector<1x1x64xf32> to vector<1x64xf32>
    %159 = vector.broadcast %158 : vector<1x64xf32> to vector<8x64xf32>
    %160 = arith.addf %156, %159 : vector<8x64xf32>
    %cst_76 = arith.constant 0.000000e+00 : f32
    %161 = vector.broadcast %cst_76 : f32 to vector<8x64xf32>
    %162 = arith.maximumf %160, %161 : vector<8x64xf32>
    %163 = arith.truncf %162 : vector<8x64xf32> to vector<8x64xbf16>
    %c2_77 = arith.constant 2 : index
    %c0_78 = arith.constant 0 : index
    %c0_79 = arith.constant 0 : index
    %164 = vector.load %arg12[%c2_77, %c0_78, %c0_79] : memref<4x64x32xbf16, #tpu.memory_space<vmem>>, vector<1x64x32xbf16>
    %165 = vector.shape_cast %164 : vector<1x64x32xbf16> to vector<64x32xbf16>
    %cst_80 = arith.constant dense<0.000000e+00> : vector<8x32xf32>
    %166 = tpu.matmul %163, %165, %cst_80 {dimension_numbers = #tpu.dot_dimension_numbers<[1], [0], [0], [1], [0, 0, 1, 1], [], []>} : vector<8x64xbf16>, vector<64x32xbf16>, vector<8x32xf32> -> vector<8x32xf32>
    %c2_81 = arith.constant 2 : index
    %c0_82 = arith.constant 0 : index
    %c0_83 = arith.constant 0 : index
    %167 = vector.load %arg13[%c2_81, %c0_82, %c0_83] : memref<4x1x32xf32, #tpu.memory_space<vmem>>, vector<1x1x32xf32>
    %168 = vector.shape_cast %167 : vector<1x1x32xf32> to vector<1x32xf32>
    %169 = vector.broadcast %168 : vector<1x32xf32> to vector<8x32xf32>
    %170 = arith.addf %166, %169 : vector<8x32xf32>
    %171 = vector.extract_strided_slice %111 {offsets = [0, 2], sizes = [8, 1], strides = [1, 1]} : vector<8x4xf32> to vector<8x1xf32>
    %172 = vector.broadcast %171 : vector<8x1xf32> to vector<8x32xf32>
    %173 = arith.mulf %172, %170 : vector<8x32xf32>
    %174 = arith.addf %153, %173 : vector<8x32xf32>
    %c3 = arith.constant 3 : index
    %c0_84 = arith.constant 0 : index
    %c0_85 = arith.constant 0 : index
    %175 = vector.load %arg10[%c3, %c0_84, %c0_85] : memref<4x32x64xbf16, #tpu.memory_space<vmem>>, vector<1x32x64xbf16>
    %176 = vector.shape_cast %175 : vector<1x32x64xbf16> to vector<32x64xbf16>
    %cst_86 = arith.constant dense<0.000000e+00> : vector<8x64xf32>
    %177 = tpu.matmul %62, %176, %cst_86 {dimension_numbers = #tpu.dot_dimension_numbers<[1], [0], [0], [1], [0, 0, 1, 1], [], []>} : vector<8x32xbf16>, vector<32x64xbf16>, vector<8x64xf32> -> vector<8x64xf32>
    %c3_87 = arith.constant 3 : index
    %c0_88 = arith.constant 0 : index
    %c0_89 = arith.constant 0 : index
    %178 = vector.load %arg11[%c3_87, %c0_88, %c0_89] : memref<4x1x64xf32, #tpu.memory_space<vmem>>, vector<1x1x64xf32>
    %179 = vector.shape_cast %178 : vector<1x1x64xf32> to vector<1x64xf32>
    %180 = vector.broadcast %179 : vector<1x64xf32> to vector<8x64xf32>
    %181 = arith.addf %177, %180 : vector<8x64xf32>
    %cst_90 = arith.constant 0.000000e+00 : f32
    %182 = vector.broadcast %cst_90 : f32 to vector<8x64xf32>
    %183 = arith.maximumf %181, %182 : vector<8x64xf32>
    %184 = arith.truncf %183 : vector<8x64xf32> to vector<8x64xbf16>
    %c3_91 = arith.constant 3 : index
    %c0_92 = arith.constant 0 : index
    %c0_93 = arith.constant 0 : index
    %185 = vector.load %arg12[%c3_91, %c0_92, %c0_93] : memref<4x64x32xbf16, #tpu.memory_space<vmem>>, vector<1x64x32xbf16>
    %186 = vector.shape_cast %185 : vector<1x64x32xbf16> to vector<64x32xbf16>
    %cst_94 = arith.constant dense<0.000000e+00> : vector<8x32xf32>
    %187 = tpu.matmul %184, %186, %cst_94 {dimension_numbers = #tpu.dot_dimension_numbers<[1], [0], [0], [1], [0, 0, 1, 1], [], []>} : vector<8x64xbf16>, vector<64x32xbf16>, vector<8x32xf32> -> vector<8x32xf32>
    %c3_95 = arith.constant 3 : index
    %c0_96 = arith.constant 0 : index
    %c0_97 = arith.constant 0 : index
    %188 = vector.load %arg13[%c3_95, %c0_96, %c0_97] : memref<4x1x32xf32, #tpu.memory_space<vmem>>, vector<1x1x32xf32>
    %189 = vector.shape_cast %188 : vector<1x1x32xf32> to vector<1x32xf32>
    %190 = vector.broadcast %189 : vector<1x32xf32> to vector<8x32xf32>
    %191 = arith.addf %187, %190 : vector<8x32xf32>
    %192 = vector.extract_strided_slice %111 {offsets = [0, 3], sizes = [8, 1], strides = [1, 1]} : vector<8x4xf32> to vector<8x1xf32>
    %193 = vector.broadcast %192 : vector<8x1xf32> to vector<8x32xf32>
    %194 = arith.mulf %193, %191 : vector<8x32xf32>
    %195 = arith.addf %174, %194 : vector<8x32xf32>
    %cst_98 = arith.constant dense<0.000000e+00> : vector<8xf32>
    %196 = vector.multi_reduction <add>, %195, %cst_98 [1] : vector<8x32xf32> to vector<8xf32>
    %197 = vector.shape_cast %196 : vector<8xf32> to vector<8x1xf32>
    %cst_99 = arith.constant 3.200000e+01 : f32
    %198 = vector.broadcast %cst_99 : f32 to vector<8x1xf32>
    %199 = arith.divf %197, %198 : vector<8x1xf32>
    %200 = vector.broadcast %199 : vector<8x1xf32> to vector<8x32xf32>
    %201 = arith.subf %195, %200 : vector<8x32xf32>
    %202 = arith.mulf %201, %201 : vector<8x32xf32>
    %cst_100 = arith.constant dense<0.000000e+00> : vector<8xf32>
    %203 = vector.multi_reduction <add>, %202, %cst_100 [1] : vector<8x32xf32> to vector<8xf32>
    %204 = vector.shape_cast %203 : vector<8xf32> to vector<8x1xf32>
    %cst_101 = arith.constant 3.200000e+01 : f32
    %205 = vector.broadcast %cst_101 : f32 to vector<8x1xf32>
    %206 = arith.divf %204, %205 : vector<8x1xf32>
    %207 = vector.broadcast %199 : vector<8x1xf32> to vector<8x32xf32>
    %208 = arith.subf %195, %207 : vector<8x32xf32>
    %cst_102 = arith.constant 9.99999974E-6 : f32
    %209 = vector.broadcast %cst_102 : f32 to vector<8x1xf32>
    %210 = arith.addf %206, %209 : vector<8x1xf32>
    %211 = math.rsqrt %210 : vector<8x1xf32>
    %212 = vector.broadcast %211 : vector<8x1xf32> to vector<8x32xf32>
    %213 = arith.mulf %208, %212 : vector<8x32xf32>
    %c0_103 = arith.constant 0 : index
    %c0_104 = arith.constant 0 : index
    %214 = vector.load %arg14[%c0_103, %c0_104] : memref<1x32xf32, #tpu.memory_space<vmem>>, vector<1x32xf32>
    %215 = vector.broadcast %214 : vector<1x32xf32> to vector<8x32xf32>
    %216 = arith.mulf %213, %215 : vector<8x32xf32>
    %c0_105 = arith.constant 0 : index
    %c0_106 = arith.constant 0 : index
    %217 = vector.load %arg15[%c0_105, %c0_106] : memref<1x32xf32, #tpu.memory_space<vmem>>, vector<1x32xf32>
    %218 = vector.broadcast %217 : vector<1x32xf32> to vector<8x32xf32>
    %219 = arith.addf %216, %218 : vector<8x32xf32>
    %c0_107 = arith.constant 0 : index
    %c0_108 = arith.constant 0 : index
    %c0_109 = arith.constant 0 : index
    %220 = vector.load %arg16[%c0_107, %c0_108, %c0_109] : memref<1x8x32xf32, #tpu.memory_space<vmem>>, vector<1x8x32xf32>
    %221 = vector.shape_cast %220 : vector<1x8x32xf32> to vector<8x32xf32>
    %222 = vector.shape_cast %219 : vector<8x32xf32> to vector<1x8x32xf32>
    tpu.vector_store %arg16[%c0_107, %c0_108, %c0_109], %222 {strides = array<i32>} : memref<1x8x32xf32, #tpu.memory_space<vmem>>, vector<1x8x32xf32>,
    return
  }
  func.func @transform_0(%arg0: i32) -> (i32, i32, i32) {
    %c0_i32 = arith.constant 0 : i32
    %c0_i32_0 = arith.constant 0 : i32
    %c0_i32_1 = arith.constant 0 : i32
    return %arg0, %c0_i32, %c0_i32_0 : i32, i32, i32
  }
  func.func @transform_1(%arg0: i32) -> (i32, i32) {
    %c0_i32 = arith.constant 0 : i32
    %c0_i32_0 = arith.constant 0 : i32
    %c0_i32_1 = arith.constant 0 : i32
    return %c0_i32, %c0_i32_0 : i32, i32
  }
  func.func @transform_2(%arg0: i32) -> (i32, i32) {
    %c0_i32 = arith.constant 0 : i32
    %c0_i32_0 = arith.constant 0 : i32
    %c0_i32_1 = arith.constant 0 : i32
    return %c0_i32, %c0_i32_0 : i32, i32
  }
  func.func @transform_3(%arg0: i32) -> (i32, i32) {
    %c0_i32 = arith.constant 0 : i32
    %c0_i32_0 = arith.constant 0 : i32
    %c0_i32_1 = arith.constant 0 : i32
    return %c0_i32, %c0_i32_0 : i32, i32
  }
  func.func @transform_4(%arg0: i32) -> (i32, i32) {
    %c0_i32 = arith.constant 0 : i32
    %c0_i32_0 = arith.constant 0 : i32
    %c0_i32_1 = arith.constant 0 : i32
    return %c0_i32, %c0_i32_0 : i32, i32
  }
  func.func @transform_5(%arg0: i32) -> (i32, i32) {
    %c0_i32 = arith.constant 0 : i32
    %c0_i32_0 = arith.constant 0 : i32
    %c0_i32_1 = arith.constant 0 : i32
    return %c0_i32, %c0_i32_0 : i32, i32
  }
  func.func @transform_6(%arg0: i32) -> (i32, i32) {
    %c0_i32 = arith.constant 0 : i32
    %c0_i32_0 = arith.constant 0 : i32
    %c0_i32_1 = arith.constant 0 : i32
    return %c0_i32, %c0_i32_0 : i32, i32
  }
  func.func @transform_7(%arg0: i32) -> (i32, i32) {
    %c0_i32 = arith.constant 0 : i32
    %c0_i32_0 = arith.constant 0 : i32
    %c0_i32_1 = arith.constant 0 : i32
    return %c0_i32, %c0_i32_0 : i32, i32
  }
  func.func @transform_8(%arg0: i32) -> (i32, i32) {
    %c0_i32 = arith.constant 0 : i32
    %c0_i32_0 = arith.constant 0 : i32
    %c0_i32_1 = arith.constant 0 : i32
    return %c0_i32, %c0_i32_0 : i32, i32
  }
  func.func @transform_9(%arg0: i32) -> (i32, i32, i32) {
    %c0_i32 = arith.constant 0 : i32
    %c0_i32_0 = arith.constant 0 : i32
    %c0_i32_1 = arith.constant 0 : i32
    %c0_i32_2 = arith.constant 0 : i32
    return %c0_i32, %c0_i32_0, %c0_i32_1 : i32, i32, i32
  }
  func.func @transform_10(%arg0: i32) -> (i32, i32, i32) {
    %c0_i32 = arith.constant 0 : i32
    %c0_i32_0 = arith.constant 0 : i32
    %c0_i32_1 = arith.constant 0 : i32
    %c0_i32_2 = arith.constant 0 : i32
    return %c0_i32, %c0_i32_0, %c0_i32_1 : i32, i32, i32
  }
  func.func @transform_11(%arg0: i32) -> (i32, i32, i32) {
    %c0_i32 = arith.constant 0 : i32
    %c0_i32_0 = arith.constant 0 : i32
    %c0_i32_1 = arith.constant 0 : i32
    %c0_i32_2 = arith.constant 0 : i32
    return %c0_i32, %c0_i32_0, %c0_i32_1 : i32, i32, i32
  }
  func.func @transform_12(%arg0: i32) -> (i32, i32, i32) {
    %c0_i32 = arith.constant 0 : i32
    %c0_i32_0 = arith.constant 0 : i32
    %c0_i32_1 = arith.constant 0 : i32
    %c0_i32_2 = arith.constant 0 : i32
    return %c0_i32, %c0_i32_0, %c0_i32_1 : i32, i32, i32
  }
  func.func @transform_13(%arg0: i32) -> (i32, i32) {
    %c0_i32 = arith.constant 0 : i32
    %c0_i32_0 = arith.constant 0 : i32
    %c0_i32_1 = arith.constant 0 : i32
    return %c0_i32, %c0_i32_0 : i32, i32
  }
  func.func @transform_14(%arg0: i32) -> (i32, i32) {
    %c0_i32 = arith.constant 0 : i32
    %c0_i32_0 = arith.constant 0 : i32
    %c0_i32_1 = arith.constant 0 : i32
    return %c0_i32, %c0_i32_0 : i32, i32
  }
  func.func @transform_15(%arg0: i32) -> (i32, i32, i32) {
    %c0_i32 = arith.constant 0 : i32
    %c0_i32_0 = arith.constant 0 : i32
    %c0_i32_1 = arith.constant 0 : i32
    return %arg0, %c0_i32, %c0_i32_0 : i32, i32, i32
  }
}

</mosaic_0001>

<bundles_post_ra>
// kernel: model_forward.5
= control target key start
LH: loop header
LB: loop body
LE: loop exit
PB: predicated region body
PF: predicated region fallthrough
CT: control target
= control target key end

     0   :  { %v176_v1 = vmov 0.0   ;;  %vm177_vm0 = vmmov 0   ;;  %vm20_vm1 = vcmask 523264   ;;  %s222_s0 = inlined_call_operand.vmem [shape: bf16[16,32], index: 0, kind: input, shape index: {}]   ;;  %s223_s1 = inlined_call_operand.vmem [shape: bf16[32,64], index: 1, kind: input, shape index: {}]   ;;  %s224_s2 = inlined_call_operand.vmem [shape: f32[1,64], index: 2, kind: input, shape index: {}]   ;;  %s225_s3 = inlined_call_operand.hbm [shape: f32[16,64], index: 3, kind: output, shape index: {}]  }
   0x1   :  { %v151_v0 = vld [vmem:[%s223_s1 + $0x8] sm:$0xff]   ;;  %138 = vmatprep.subr.bf16.mxu0 %v176_v1  ;;  %v152_v2 = vld [vmem:[%s223_s1] sm:$0xff]   ;;  %142 = vmatprep.mubr.msk.bf16.mxu0 %vm177_vm0, %v176_v1 }
   0x2   :  { %139 = vmatpush3.bf16.msra.mxu0 %v151_v0 }
   0x3   :  { %140 = vmatprep.subr.bf16.mxu0 %v176_v1 }
   0x4   :  { %8 = vsyncpa [#allocation4], 0  ;;  %21 = vst.msk [vmem:[#allocation2] sm:$0xff] %vm20_vm1, %v176_v1  ;;  %v153_v3 = vld [vmem:[%s222_s0] sm:$0xff]   ;;  %vm48_vm2 = vcmask 261120   ;;  %s178_s0 = smov [#allocation3]  }
   0x5   :  { %22 = vst.msk [vmem:[#allocation2 + $0x8] sm:$0xff] %vm20_vm1, %v176_v1  ;;  %v134_v12 = vld [vmem:[%s224_s2] ss:$0 sm:$0xff]  ;;  %s119_s19 = sshll.u32 %s178_s0, 4  ;;  %s120_s19 = int_to_ptr.vmem [resolvable:$true] %s119_s19 }
   0x6   :  { %141 = vmatpush3.bf16.msra.mxu0 %v152_v2  ;;  %s154_s20 = scalar_lea.vmem %s120_s19, 256  ;;  %p159_p1 = scmp.lt.s32.totalorder %s120_s19, %s120_s19 }
   0x7   :  { %p155_p0 = scmp.ne.s32.totalorder %s120_s19, %s154_s20  ;;  %p160_p2 = scmp.lt.s32.totalorder %s154_s20, %s154_s20 }
   0x9   :  { %143 = vmatmul.mubr.msk.bf16.vlgmr.msra.gmra.mxu0 %vm48_vm2, %v153_v3  ;;  %p161_p3 = por %p160_p2, %p159_p1 }
   0xb   :  { %v23_v4 = vld [vmem:[#allocation2] sm:$0xff]  ;;  %p162_p4 = pnand %p161_p3, %p155_p0 }
   0xc   :  { %v24_v8 = vld [vmem:[#allocation2 + $0x8] sm:$0xff] }
  0xc9   :  { %v86_v5 = vpop.f32.mrf.mxu0 }
  0xca   :  { %v93_v6 = vadd.f32 %v86_v5, %v23_v4 }
  0xcb   :  { %v144_v7 = vpop.f32.mrf.mxu0 }
  0xcc   :  { %96 = vst.msk [vmem:[#allocation2] sm:$0xff] %vm20_vm1, %v93_v6 }
  0xcd   :  { %v89_v9 = vpop.f32.mrf.mxu0 }
  0xce   :  { %v94_v10 = vadd.f32 %v89_v9, %v24_v8 }
  0xcf   :  { %v145_v11 = vpop.f32.mrf.mxu0 }
  0xd0   :  { %97 = vst.msk [vmem:[#allocation2 + $0x8] sm:$0xff] %vm20_vm1, %v94_v10 }
  0xd3   :  { %v101_v13 = vld [vmem:[#allocation2] sm:$0xff] }
  0xd4   :  { %v110_v14 = vadd.f32 %v134_v12, %v101_v13 }
  0xd6   :  { %112 = vst.msk [vmem:[#allocation3] sm:$0xff] %vm20_vm1, %v110_v14 }
  0xd7   :  { %v102_v15 = vld [vmem:[#allocation2 + $0x8] sm:$0xff] }
  0xd8   :  { %v111_v16 = vadd.f32 %v134_v12, %v102_v15 }
  0xda   :  { %113 = vst.msk [vmem:[#allocation3 + $0x8] sm:$0xff] %vm20_vm1, %v111_v16 }
  0xdb   :  { %165 = shalt.err (!%p162_p4)
}
  0xdc   :  { %s179_s21 = smov 128   ;;  %s180_s2 = smov 8  }
  0xdd   :  { %125 = dma.vmem_to_hbm [thread:$0]  %s120_s19, 256, %s225_s3, [#allocation4], %s179_s21, %s179_s21, %s180_s2  }
  0xde   :  { %174 = dma.done.wait [#allocation4], 256  }
  0xdf   :  { %175 = vsyncadd [#allocation4], 4294967040 }
  0xe0   :  { %129 = vsyncpa [#allocation4], 1 }

// kernel: model_forward.3
= control target key start
LH: loop header
LB: loop body
LE: loop exit
PB: predicated region body
PF: predicated region fallthrough
CT: control target
= control target key end

     0   :  { %s3062_s18 = smov 0   ;;  %s3481_s0 = inlined_call_operand.vmem [shape: f32[2,8,32], index: 0, kind: input, shape index: {}]   ;;  %s3482_s1 = inlined_call_operand.vmem [shape: bf16[32,96], index: 1, kind: input, shape index: {}]   ;;  %s3483_s2 = inlined_call_operand.vmem [shape: f32[1,96], index: 2, kind: input, shape index: {}]   ;;  %s3484_s3 = inlined_call_operand.vmem [shape: bf16[32,32], index: 3, kind: input, shape index: {}]   ;;  %s3485_s4 = inlined_call_operand.vmem [shape: f32[1,32], index: 4, kind: input, shape index: {}]   ;;  %s3486_s5 = inlined_call_operand.vmem [shape: bf16[32,4], index: 5, kind: input, shape index: {}]   ;;  %s3487_s6 = inlined_call_operand.vmem [shape: f32[1,4], index: 6, kind: input, shape index: {}]   ;;  %s3488_s7 = inlined_call_operand.vmem [shape: f32[1,32], index: 7, kind: input, shape index: {}]   ;;  %s3489_s8 = inlined_call_operand.vmem [shape: f32[1,32], index: 8, kind: input, shape index: {}]   ;;  %s3490_s9 = inlined_call_operand.vmem [shape: bf16[4,32,64], index: 9, kind: input, shape index: {}]   ;;  %s3491_s10 = inlined_call_operand.vmem [shape: f32[4,1,64], index: 10, kind: input, shape index: {}]   ;;  %s3492_s11 = inlined_call_operand.vmem [shape: bf16[4,64,32], index: 11, kind: input, shape index: {}]   ;;  %s3493_s12 = inlined_call_operand.vmem [shape: f32[4,1,32], index: 12, kind: input, shape index: {}]   ;;  %s3494_s13 = inlined_call_operand.vmem [shape: f32[1,32], index: 13, kind: input, shape index: {}]   ;;  %s3495_s14 = inlined_call_operand.vmem [shape: f32[1,32], index: 14, kind: input, shape index: {}]   ;;  %s3496_s15 = inlined_call_operand.vmem [shape: f32[2,8,32], index: 15, kind: output, shape index: {}]  }
   0x1 LB: > { %s2525_s19 = sadd.s32 4294967295, %s2958_s18   ;;  %p2529_p0 = scmp.ge.s32.totalorder %s2958_s18, 1  ;;  %s2958_s18 = sphi %s3062_s18, %s25_s18  }
   0x2   : > { %p436_p1 = scmp.lt.s32.totalorder %s2958_s18, 3 }
   0x4   : > { %p437_p2 = pnand %p2529_p0, %p436_p1 }
   0x5   : > { %p482_p3 = scmp.lt.s32.totalorder (!%p437_p2), %s2525_s19, 1  ;;  %s2962_s30 = smov (!%p437_p2), 80  }
   0x6   : > { %440 = sbr.rel (%p437_p2) target bundleno = 3735 (0xe97), region = 80  ;;  %s2963_s16 = smov (!%p437_p2), 96  }
   0x7   : > { %s2964_s17 = smov (!%p437_p2), 72   ;;  %s2965_s20 = smov (!%p437_p2), 88  }
   0x8   : > { %s2966_s21 = smov (!%p437_p2), 112   ;;  %s2967_s22 = smov (!%p437_p2), 120  }
   0x9   : > { %s2968_s23 = smov (!%p437_p2), 104   ;;  %s2971_s25 = smov (!%p437_p2), 56  }
   0xa   : > { %s2972_s26 = smov (!%p437_p2), 64   ;;  %s2974_s28 = smov (!%p437_p2), 40  }
   0xb   : > { %v2896_v0 = vld [vmem:[%s3482_s1 + $0x8] sm:$0xff]   ;;  %v2960_v1 = vmov 0.0   ;;  %v2897_v2 = vld [vmem:[%s3482_s1] sm:$0xff]   ;;  %vm2961_vm0 = vmmov 0   ;;  %s3498_s19 = smov (!%p482_p3, %s2525_s19), 1  ;;  %vm516_vm1 = vcmask 261120   ;;  %v599_v13 = vlaneseq }
   0xc   : > { %2709 = vmatprep.subr.bf16.mxu0 %v2960_v1  ;;  %2717 = vmatprep.subr.bf16.mxu1 %v2960_v1  ;;  %s2530_s24 = sshll.u32 %s3498_s19, 3  ;;  %v2532_v5 = vld [vmem:[%s3483_s2] ss:$0 sm:$0xff]  ;;  %v2969_v11 = vmov 1983009808   ;;  %vm1014_vm2 = vcmask 64512  }
   0xd   : > { %2710 = vmatpush3.bf16.msra.mxu0 %v2896_v0  ;;  %2713 = vmatprep.mubr.msk.bf16.mxu0 %vm2961_vm0, %v2960_v1  ;;  %s485_s27 = scalar_lea.vmem %s3481_s0, %s2530_s24  ;;  %v597_v12 = vunpack.c.l.s4 %v2969_v11  ;;  %v2970_v14 = vmov 1934713408   ;;  %v600_v17 = vshrl.u32 %v599_v13, 7  ;;  %vm1250_vm3 = vcmask 1043456  }
   0xe   : > { %2711 = vmatprep.subr.bf16.mxu0 %v2960_v1  ;;  %2719 = vmatprep.mubr.msk.bf16.mxu1 %vm2961_vm0, %v2960_v1  ;;  %v3092_v3 = vld [vmem:[%s485_s27] sm:$0xff]  ;;  %v661_v15 = vunpack.c.l.s4 %v2970_v14  ;;  %s2973_s27 = smov 48   ;;  %vm1581_vm4 = vcmask 130048   ;;  %vm1583_vm5 = vcmask 195584   ;;  %vm1750_vm6 = vcmask 31744  }
   0xf   : > { %v492_v4 = vpack.c.bf16 %v3092_v3, %v3092_v3  ;;  %v598_v16 = vunpack.c.0.s8 %v597_v12  ;;  %vm1920_vm7 = vcmask 523264  }
  0x10   : > { %v662_v20 = vunpack.c.0.s8 %v661_v15 }
  0x11   : > { %2712 = vmatpush3.bf16.msra.mxu0 %v2897_v2  ;;  %v3112_v21 = vsub.s32 %v598_v16, %v600_v17 }
  0x12   : > { %2723 = vmatprep.subr.bf16.mxu0 %v2960_v1  ;;  %v3114_v28 = vsub.s32 %v662_v20, %v600_v17 }
  0x14   : > { %2714 = vmatmul.mubr.msk.bf16.vlgmr.msra.gmra.mxu0 %vm516_vm1, %v492_v4 }
  0x15   : > { %2725 = vmatprep.mubr.msk.bf16.mxu0 %vm2961_vm0, %v2960_v1 }
  0xd4   : > { %v554_v6 = vpop.f32.mrf.mxu0 }
  0xd5   : > { %v3102_v7 = vadd.f32 %v2532_v5, %v554_v6 }
  0xd6   : > { %v2715_v8 = vpop.f32.mrf.mxu0 }
  0xd7   : > { %576 = vrot.lane.b32.xlu1 %v3102_v7, %s2962_s30  ;;  %570 = vrot.lane.b32.xlu0 %v3102_v7, %s2963_s16 }
  0xd8   : > { %v557_v9 = vpop.f32.mrf.mxu0 }
  0xda   : > { %v2716_v10 = vpop.f32.mrf.mxu0 }
  0xdb   : > { %579 = vrot.lane.b32.xlu1 %v3102_v7, %s2964_s17  ;;  %573 = vrot.lane.b32.xlu0 %v3102_v7, %s2965_s20  ;;  %s2975_s20 = smov 16  }
  0xdf   : > { %564 = vrot.lane.b32.xlu1 %v3102_v7, %s2966_s21  ;;  %561 = vrot.lane.b32.xlu0 %v3102_v7, %s2967_s22  ;;  %s2976_s21 = smov 8   ;;  %s2977_s22 = smov 24  }
  0xe3   : > { %567 = vrot.lane.b32.xlu0 %v3102_v7, %s2968_s23 }
 0x149   : > { %v577_v18 = vpop.permute.xlu1 %576  ;;  %v571_v19 = vpop.permute.xlu0 %570 }
 0x14a   : > { %v626_v22 = vcombine.low %v571_v19, %v577_v18  ;;  %v627_v23 = vcombine.high %v571_v19, %v577_v18 }
 0x14c   : > { %v634_v29 = vrot.slane %v626_v22, %v3112_v21  ;;  %v641_v30 = vrot.slane %v627_v23, %v3112_v21 }
 0x14d   : > { %v580_v24 = vpop.permute.xlu1 %579  ;;  %v574_v25 = vpop.permute.xlu0 %573 }
 0x14e   : > { %v642_v26 = vcombine.low %v574_v25, %v580_v24  ;;  %v643_v27 = vcombine.high %v574_v25, %v580_v24 }
 0x150   : > { %v650_v31 = vrot.slane %v642_v26, %v3112_v21  ;;  %v657_v32 = vrot.slane %v643_v27, %v3112_v21 }
 0x151   : > { %v562_v33 = vpop.permute.xlu0 %561  ;;  %v565_v38 = vpop.permute.xlu1 %564 }
 0x152   : > { %v690_v34 = vcombine.low %v634_v29, %v650_v31  ;;  %v691_v35 = vcombine.high %v634_v29, %v650_v31  ;;  %v706_v36 = vcombine.low %v641_v30, %v657_v32  ;;  %v707_v37 = vcombine.high %v641_v30, %v657_v32 }
 0x153   : > { %v594_v43 = vcombine.low %v3102_v7, %v565_v38  ;;  %v595_v44 = vcombine.high %v3102_v7, %v565_v38 }
 0x154   : > { %v698_v39 = vrot.slane %v690_v34, %v3114_v28  ;;  %v705_v40 = vrot.slane %v691_v35, %v3114_v28  ;;  %v714_v41 = vrot.slane %v706_v36, %v3114_v28  ;;  %v721_v42 = vrot.slane %v707_v37, %v3114_v28 }
 0x155   : > { %v568_v45 = vpop.permute.xlu0 %567  ;;  %v602_v56 = vrot.slane %v594_v43, %v3112_v21  ;;  %v609_v57 = vrot.slane %v595_v44, %v3112_v21 }
 0x156   : > { %v2537_v46 = vcombine.low %v698_v39, %v705_v40  ;;  %v2539_v47 = vcombine.high %v698_v39, %v705_v40  ;;  %v2541_v48 = vcombine.low %v714_v41, %v721_v42  ;;  %v2543_v49 = vcombine.high %v714_v41, %v721_v42 }
 0x157   : > { %v610_v50 = vcombine.low %v562_v33, %v568_v45  ;;  %v611_v51 = vcombine.high %v562_v33, %v568_v45 }
 0x158   : > { %v813_v52 = vrot.slane %v2537_v46, %v3112_v21  ;;  %v829_v53 = vrot.slane %v2539_v47, %v3112_v21  ;;  %v845_v54 = vrot.slane %v2541_v48, %v3112_v21  ;;  %v861_v55 = vrot.slane %v2543_v49, %v3112_v21 }
 0x159   : > { %v618_v58 = vrot.slane %v610_v50, %v3112_v21  ;;  %v625_v59 = vrot.slane %v611_v51, %v3112_v21 }
 0x15a   : > { %v878_v60 = vcombine.low %v813_v52, %v829_v53  ;;  %v910_v61 = vcombine.low %v845_v54, %v861_v55  ;;  %v879_v6 = vcombine.high %v813_v52, %v829_v53  ;;  %v911_v8 = vcombine.high %v845_v54, %v861_v55 }
 0x15b   : > { %v658_v62 = vcombine.low %v602_v56, %v618_v58  ;;  %v659_v63 = vcombine.high %v602_v56, %v618_v58  ;;  %v674_v0 = vcombine.low %v609_v57, %v625_v59  ;;  %v675_v2 = vcombine.high %v609_v57, %v625_v59 }
 0x15c   : > { %v886_v4 = vrot.slane %v878_v60, %v3114_v28  ;;  %v918_v5 = vrot.slane %v910_v61, %v3114_v28  ;;  %v893_v23 = vrot.slane %v879_v6, %v3114_v28  ;;  %v925_v24 = vrot.slane %v911_v8, %v3114_v28 }
 0x15d   : > { %v666_v9 = vrot.slane %v658_v62, %v3114_v28  ;;  %v673_v10 = vrot.slane %v659_v63, %v3114_v28  ;;  %v682_v11 = vrot.slane %v674_v0, %v3114_v28  ;;  %v689_v12 = vrot.slane %v675_v2, %v3114_v28 }
 0x15e   : > { %v930_v14 = vcombine.low %v886_v4, %v918_v5  ;;  %v931_v15 = vcombine.high %v886_v4, %v918_v5  ;;  %v932_v34 = vcombine.low %v893_v23, %v925_v24  ;;  %v933_v35 = vcombine.high %v893_v23, %v925_v24 }
 0x15f   : > { %v2536_v16 = vcombine.low %v666_v9, %v673_v10  ;;  %v2538_v17 = vcombine.high %v666_v9, %v673_v10  ;;  %v2540_v18 = vcombine.low %v682_v11, %v689_v12  ;;  %v2542_v19 = vcombine.high %v682_v11, %v689_v12 }
 0x160   : > { %v1006_v20 = vpack.c.bf16 %v930_v14, %v930_v14  ;;  %v1007_v22 = vpack.c.bf16 %v931_v15, %v931_v15  ;;  %v1008_v42 = vpack.c.bf16 %v932_v34, %v932_v34  ;;  %v1009_v43 = vpack.c.bf16 %v933_v35, %v933_v35 }
 0x161   : > { %v806_v25 = vrot.slane %v2536_v16, %v3112_v21  ;;  %v822_v26 = vrot.slane %v2538_v17, %v3112_v21  ;;  %v838_v27 = vrot.slane %v2540_v18, %v3112_v21  ;;  %v854_v29 = vrot.slane %v2542_v19, %v3112_v21 }
 0x162   : > { %v1019_v30 = vsel %vm1014_vm2, %v1006_v20, 0  ;;  %v1065_v31 = vsel %vm1014_vm2, %v1007_v22, 0  ;;  %v1111_v48 = vsel %vm1014_vm2, %v1008_v42, 0  ;;  %v1157_v49 = vsel %vm1014_vm2, %v1009_v43, 0 }
 0x163   : > { %2718 = vmatpush3.bf16.xpose.msra.mxu1 %v1019_v30  ;;  %2724 = vmatpush3.bf16.xpose.msra.mxu0 %v1065_v31  ;;  %v862_v32 = vcombine.low %v806_v25, %v822_v26  ;;  %v894_v33 = vcombine.low %v838_v27, %v854_v29  ;;  %v863_v37 = vcombine.high %v806_v25, %v822_v26 }
 0x164   : > { %2729 = vmatprep.subr.bf16.mxu1 %v2960_v1  ;;  %2735 = vmatprep.subr.bf16.mxu0 %v2960_v1  ;;  %v895_v38 = vcombine.high %v838_v27, %v854_v29 }
 0x165   : > { %v870_v36 = vrot.slane %v862_v32, %v3114_v28  ;;  %v902_v39 = vrot.slane %v894_v33, %v3114_v28  ;;  %v877_v46 = vrot.slane %v863_v37, %v3114_v28 }
 0x166   : > { %v909_v47 = vrot.slane %v895_v38, %v3114_v28 }
 0x167   : > { %v926_v40 = vcombine.low %v870_v36, %v902_v39  ;;  %v927_v41 = vcombine.high %v870_v36, %v902_v39 }
 0x168   : > { %v928_v50 = vcombine.low %v877_v46, %v909_v47  ;;  %v929_v51 = vcombine.high %v877_v46, %v909_v47 }
 0x169   : > { %v1002_v44 = vpack.c.bf16 %v926_v40, %v926_v40  ;;  %v1003_v45 = vpack.c.bf16 %v927_v41, %v927_v41 }
 0x16a   : > { %v1004_v52 = vpack.c.bf16 %v928_v50, %v928_v50  ;;  %v1005_v53 = vpack.c.bf16 %v929_v51, %v929_v51 }
 0x16b   : > { %2720 = vmatmul.mubr.msk.bf16.vlgmr.msra.gmra.mxu1 %vm1014_vm2, %v1002_v44  ;;  %2726 = vmatmul.mubr.msk.bf16.vlgmr.msra.gmra.mxu0 %vm1014_vm2, %v1003_v45 }
 0x16c   : > { %2730 = vmatpush3.bf16.xpose.msra.mxu1 %v1111_v48  ;;  %2736 = vmatpush3.bf16.xpose.msra.mxu0 %v1157_v49 }
 0x16d   : > { %2731 = vmatprep.mubr.msk.bf16.mxu1 %vm2961_vm0, %v2960_v1  ;;  %2737 = vmatprep.mubr.msk.bf16.mxu0 %vm2961_vm0, %v2960_v1 }
 0x16e   : > { %2741 = vmatprep.subr.bf16.mxu1 %v2960_v1  ;;  %2747 = vmatprep.subr.bf16.mxu0 %v2960_v1 }
 0x173   : > { %2732 = vmatmul.mubr.msk.bf16.vlgmr.msra.gmra.mxu1 %vm1014_vm2, %v1004_v52  ;;  %2738 = vmatmul.mubr.msk.bf16.vlgmr.msra.gmra.mxu0 %vm1014_vm2, %v1005_v53 }
 0x174   : > { %2743 = vmatprep.mubr.msk.bf16.mxu1 %vm2961_vm0, %v2960_v1  ;;  %2749 = vmatprep.mubr.msk.bf16.mxu0 %vm2961_vm0, %v2960_v1 }
 0x22b   : > { %v1055_v54 = vpop.f32.mrf.mxu1  ;;  %v1101_v55 = vpop.f32.mrf.mxu0 }
 0x22c   : > { %v1199_v56 = vsel %vm1014_vm2, %v1055_v54, -inf  ;;  %v1202_v57 = vsel %vm1014_vm2, %v1101_v55, -inf }
 0x22d   : > { %1200 = vmax.xlane.f32.xlu1 %v1199_v56  ;;  %v2721_v58 = vpop.f32.mrf.mxu1  ;;  %1203 = vmax.xlane.f32.xlu0 %v1202_v57  ;;  %v2727_v59 = vpop.f32.mrf.mxu0 }
 0x22f   : > { %v1058_v60 = vpop.f32.mrf.mxu1  ;;  %v1104_v61 = vpop.f32.mrf.mxu0 }
 0x231   : > { %v2722_v62 = vpop.f32.mrf.mxu1  ;;  %v2728_v63 = vpop.f32.mrf.mxu0 }
 0x233   : > { %v1147_v0 = vpop.f32.mrf.mxu1  ;;  %v1193_v2 = vpop.f32.mrf.mxu0 }
 0x234   : > { %v1205_v4 = vsel %vm1014_vm2, %v1147_v0, -inf  ;;  %v1208_v5 = vsel %vm1014_vm2, %v1193_v2, -inf }
 0x235   : > { %v2733_v6 = vpop.f32.mrf.mxu1  ;;  %1206 = vmax.xlane.f32.xlu0 %v1205_v4  ;;  %1209 = vmax.xlane.f32.xlu1 %v1208_v5  ;;  %v2739_v8 = vpop.f32.mrf.mxu0 }
 0x237   : > { %v1150_v9 = vpop.f32.mrf.mxu1  ;;  %v1196_v10 = vpop.f32.mrf.mxu0 }
 0x239   : > { %v2734_v11 = vpop.f32.mrf.mxu1  ;;  %v2740_v12 = vpop.f32.mrf.mxu0 }
 0x246   : > { %585 = vrot.lane.b32.xlu1 %v3102_v7, %s2971_s25 }
 0x24b   : > { %582 = vrot.lane.b32.xlu0 %v3102_v7, %s2972_s26 }
 0x2b6   : > { %v1201_v14 = vpop.xlane.xlu1 %1200  ;;  %v1204_v15 = vpop.xlane.xlu0 %1203 }
 0x2b7   : > { %v1211_v16 = vsub.f32 %v1055_v54, %v1201_v14  ;;  %v1212_v17 = vsub.f32 %v1101_v55, %v1204_v15 }
 0x2b9   : > { %v1215_v18 = vmul.f32 1.442695, %v1211_v16  ;;  %v1217_v19 = vmul.f32 1.442695, %v1212_v17 }
 0x2bb   : > { %2926 = vpow2.f32 %v1215_v18 }
 0x2bc   : > { %2928 = vpow2.f32 %v1217_v19 }
 0x2be   : > { %v1210_v25 = vpop.xlane.xlu1 %1209  ;;  %v1207_v26 = vpop.xlane.xlu0 %1206 }
 0x2bf   : > { %v1214_v27 = vsub.f32 %v1193_v2, %v1210_v25  ;;  %v1213_v29 = vsub.f32 %v1147_v0, %v1207_v26 }
 0x2c1   : > { %v1221_v30 = vmul.f32 1.442695, %v1214_v27  ;;  %v1219_v31 = vmul.f32 1.442695, %v1213_v29 }
 0x2c2   : > { %v586_v36 = vpop.permute.xlu1 %585 }
 0x2c3   : > { %2930 = vpow2.f32 %v1221_v30 }
 0x2c4   : > { %2932 = vpow2.f32 %v1219_v31 }
 0x2c8   : > { %v3176_v20 = vpop.eup %2926 }
 0x2c9   : > { %v3178_v22 = vpop.eup %2928  ;;  %v1223_v23 = vsel %vm1014_vm2, %v3176_v20, 0.0 }
 0x2ca   : > { %1224 = vadd.xlane.f32.xlu0 %v1223_v23  ;;  %v1226_v24 = vsel %vm1014_vm2, %v3178_v22, 0.0 }
 0x2cb   : > { %1227 = vadd.xlane.f32.xlu1 %v1226_v24 }
 0x2d0   : > { %v3186_v32 = vpop.eup %2930 }
 0x2d1   : > { %v3188_v33 = vpop.eup %2932  ;;  %v1232_v34 = vsel %vm1014_vm2, %v3186_v32, 0.0 }
 0x2d2   : > { %v1229_v35 = vsel %vm1014_vm2, %v3188_v33, 0.0 }
 0x2dc   : > { %588 = vrot.lane.b32.xlu1 %v3102_v7, %s2973_s27 }
 0x2e0   : > { %591 = vrot.lane.b32.xlu0 %v3102_v7, %s2974_s28  ;;  %v583_v7 = vpop.permute.xlu0 %582 }
 0x2ff   : > { %1233 = vadd.xlane.f32.xlu0 %v1232_v34 }
 0x300   : > { %1230 = vadd.xlane.f32.xlu1 %v1229_v35 }
 0x353   : > { %v1225_v37 = vpop.xlane.xlu0 %1224 }
 0x354   : > { %v1228_v38 = vpop.xlane.xlu1 %1227  ;;  %2934 = vrcp.f32 %v1225_v37 }
 0x355   : > { %2936 = vrcp.f32 %v1228_v38 }
 0x357   : > { %v592_v39 = vpop.permute.xlu0 %591 }
 0x358   : > { %v746_v40 = vcombine.low %v586_v36, %v592_v39  ;;  %v747_v41 = vcombine.high %v586_v36, %v592_v39  ;;  %v589_v42 = vpop.permute.xlu1 %588 }
 0x359   : > { %v730_v43 = vcombine.low %v583_v7, %v589_v42  ;;  %v731_v44 = vcombine.high %v583_v7, %v589_v42 }
 0x35a   : > { %v754_v45 = vrot.slane %v746_v40, %v3112_v21  ;;  %v761_v46 = vrot.slane %v747_v41, %v3112_v21 }
 0x35b   : > { %v738_v47 = vrot.slane %v730_v43, %v3112_v21  ;;  %v745_v48 = vrot.slane %v731_v44, %v3112_v21 }
 0x35d   : > { %v762_v49 = vcombine.low %v738_v47, %v754_v45  ;;  %v763_v50 = vcombine.high %v738_v47, %v754_v45  ;;  %v778_v51 = vcombine.low %v745_v48, %v761_v46  ;;  %v779_v52 = vcombine.high %v745_v48, %v761_v46 }
 0x35f   : > { %v770_v53 = vrot.slane %v762_v49, %v3114_v28  ;;  %v777_v54 = vrot.slane %v763_v50, %v3114_v28  ;;  %v786_v55 = vrot.slane %v778_v51, %v3114_v28  ;;  %v793_v56 = vrot.slane %v779_v52, %v3114_v28 }
 0x361   : > { %v934_v57 = vcombine.low %v770_v53, %v777_v54  ;;  %v2544_v58 = vcombine.high %v770_v53, %v777_v54  ;;  %v950_v59 = vcombine.low %v786_v55, %v793_v56  ;;  %v2545_v60 = vcombine.high %v786_v55, %v793_v56  ;;  %v2935_v8 = vpop.eup %2934 }
 0x362   : > { %v2937_v14 = vpop.eup %2936  ;;  %v1239_v24 = vmul.f32 %v2935_v8, %v3176_v20 }
 0x363   : > { %v941_v61 = vrot.slane %v934_v57, %v3112_v21  ;;  %v949_v62 = vrot.slane %v2544_v58, %v3112_v21  ;;  %v957_v63 = vrot.slane %v950_v59, %v3112_v21  ;;  %v965_v0 = vrot.slane %v2545_v60, %v3112_v21 }
 0x364   : > { %v1240_v25 = vmul.f32 %v2937_v14, %v3178_v22  ;;  %v1243_v31 = vpack.c.bf16 %v1239_v24, %v1239_v24 }
 0x365   : > { %v966_v2 = vcombine.low %v941_v61, %v949_v62  ;;  %v982_v4 = vcombine.low %v957_v63, %v965_v0  ;;  %v967_v5 = vcombine.high %v941_v61, %v949_v62  ;;  %v983_v6 = vcombine.high %v957_v63, %v965_v0 }
 0x366   : > { %v1244_v34 = vpack.c.bf16 %v1240_v25, %v1240_v25 }
 0x367   : > { %v974_v9 = vrot.slane %v966_v2, %v3114_v28  ;;  %v990_v10 = vrot.slane %v982_v4, %v3114_v28  ;;  %v981_v11 = vrot.slane %v967_v5, %v3114_v28  ;;  %v997_v12 = vrot.slane %v983_v6, %v3114_v28  ;;  %v2898_v5 = vld [vmem:[%s3484_s3 + $0x8] sm:$0xff]  }
 0x369   : > { %v998_v15 = vcombine.low %v974_v9, %v990_v10  ;;  %v999_v16 = vcombine.high %v974_v9, %v990_v10  ;;  %v1000_v17 = vcombine.low %v981_v11, %v997_v12  ;;  %v1001_v18 = vcombine.high %v981_v11, %v997_v12 }
 0x36b   : > { %v1010_v19 = vpack.c.bf16 %v998_v15, %v998_v15  ;;  %v1011_v23 = vpack.c.bf16 %v999_v16, %v999_v16  ;;  %v1012_v29 = vpack.c.bf16 %v1000_v17, %v1000_v17  ;;  %v1013_v30 = vpack.c.bf16 %v1001_v18, %v1001_v18  ;;  %v2899_v17 = vld [vmem:[%s3484_s3] sm:$0xff]  }
 0x36d   : > { %v1252_v26 = vsel %vm1250_vm3, %v1010_v19, 0  ;;  %v1298_v27 = vsel %vm1250_vm3, %v1011_v23, 0  ;;  %v1344_v20 = vsel %vm1250_vm3, %v1012_v29, 0  ;;  %v1390_v22 = vsel %vm1250_vm3, %v1013_v30, 0 }
 0x36e   : > { %2742 = vmatpush3.bf16.msra.mxu1 %v1252_v26  ;;  %2748 = vmatpush3.bf16.msra.mxu0 %v1298_v27 }
 0x36f   : > { %2753 = vmatprep.subr.bf16.mxu1 %v2960_v1  ;;  %2759 = vmatprep.subr.bf16.mxu0 %v2960_v1 }
 0x371   : > { %2744 = vmatmul.mubr.msk.bf16.vlgmr.msra.gmra.mxu1 %vm1014_vm2, %v1243_v31  ;;  %2750 = vmatmul.mubr.msk.bf16.vlgmr.msra.gmra.mxu0 %vm1014_vm2, %v1244_v34 }
 0x372   : > { %2754 = vmatpush3.bf16.msra.mxu1 %v1344_v20  ;;  %2760 = vmatpush3.bf16.msra.mxu0 %v1390_v22 }
 0x373   : > { %2755 = vmatprep.mubr.msk.bf16.mxu1 %vm2961_vm0, %v2960_v1  ;;  %2761 = vmatprep.mubr.msk.bf16.mxu0 %vm2961_vm0, %v2960_v1 }
 0x374   : > { %2765 = vmatprep.subr.bf16.mxu1 %v2960_v1  ;;  %2773 = vmatprep.subr.bf16.mxu0 %v2960_v1 }
 0x388   : > { %v1234_v35 = vpop.xlane.xlu0 %1233 }
 0x389   : > { %2938 = vrcp.f32 %v1234_v35  ;;  %v1231_v7 = vpop.xlane.xlu1 %1230 }
 0x38a   : > { %2940 = vrcp.f32 %v1231_v7 }
 0x396   : > { %v2939_v36 = vpop.eup %2938 }
 0x397   : > { %v2941_v37 = vpop.eup %2940  ;;  %v1242_v38 = vmul.f32 %v2939_v36, %v3186_v32 }
 0x398   : > { %v1241_v39 = vmul.f32 %v2941_v37, %v3188_v33 }
 0x399   : > { %v1246_v40 = vpack.c.bf16 %v1242_v38, %v1242_v38 }
 0x39a   : > { %v1245_v41 = vpack.c.bf16 %v1241_v39, %v1241_v39 }
 0x39b   : > { %2762 = vmatmul.mubr.msk.bf16.vlgmr.msra.gmra.mxu0 %vm1014_vm2, %v1246_v40 }
 0x39c   : > { %2756 = vmatmul.mubr.msk.bf16.vlgmr.msra.gmra.mxu1 %vm1014_vm2, %v1245_v41  ;;  %2777 = vmatprep.mubr.msk.bf16.mxu0 %vm2961_vm0, %v2960_v1 }
 0x39d   : > { %2769 = vmatprep.mubr.msk.bf16.mxu1 %vm2961_vm0, %v2960_v1  ;;  %2766 = vmatpush3.bf16.msra.mxu1 %v2898_v5  ;;  %v2906_v5 = vld [vmem:[%s3492_s11 + $0x18] sm:$0xff]  }
 0x39e   : > { %2767 = vmatprep.subr.bf16.mxu1 %v2960_v1 }
 0x3a1   : > { %2768 = vmatpush3.bf16.msra.mxu1 %v2899_v17  ;;  %v2566_v17 = vld [vmem:[%s3491_s10] ss:$0 sm:$0xff] }
 0x3a2   : > { %2781 = vmatprep.subr.bf16.mxu1 %v2960_v1 }
 0x431   : > { %v1288_v42 = vpop.f32.mrf.mxu1  ;;  %v1334_v43 = vpop.f32.mrf.mxu0 }
 0x433   : > { %v2745_v44 = vpop.f32.mrf.mxu1  ;;  %v2751_v45 = vpop.f32.mrf.mxu0 }
 0x435   : > { %v1291_v46 = vpop.f32.mrf.mxu1  ;;  %v1337_v32 = vpop.f32.mrf.mxu0 }
 0x437   : > { %v2746_v47 = vpop.f32.mrf.mxu1  ;;  %v2752_v33 = vpop.f32.mrf.mxu0 }
 0x45b   : > { %v1426_v48 = vpop.f32.mrf.mxu0 }
 0x45c   : > { %v1380_v49 = vpop.f32.mrf.mxu1  ;;  %v1448_v50 = vcombine.low %v1334_v43, %v1426_v48  ;;  %v1449_v51 = vcombine.high %v1334_v43, %v1426_v48 }
 0x45d   : > { %v1432_v52 = vcombine.low %v1288_v42, %v1380_v49  ;;  %v1433_v53 = vcombine.high %v1288_v42, %v1380_v49  ;;  %v2763_v54 = vpop.f32.mrf.mxu0  ;;  %v2556_v42 = vld [vmem:[%s3485_s4] ss:$0 sm:$0xff] }
 0x45e   : > { %v1456_v55 = vrot.slane %v1448_v50, %v3112_v21  ;;  %v1463_v56 = vrot.slane %v1449_v51, %v3112_v21  ;;  %v2757_v57 = vpop.f32.mrf.mxu1  ;;  %v2902_v54 = vld [vmem:[%s3486_s5] sm:$0xff]  }
 0x45f   : > { %v1440_v58 = vrot.slane %v1432_v52, %v3112_v21  ;;  %v1447_v59 = vrot.slane %v1433_v53, %v3112_v21  ;;  %v1429_v60 = vpop.f32.mrf.mxu0  ;;  %v2900_v53 = vld [vmem:[%s3486_s5 + $0x8] sm:$0xff]  }
 0x460   : > { %v1383_v61 = vpop.f32.mrf.mxu1  ;;  %2774 = vmatpush3.bf16.msra.mxu0 %v2900_v53  ;;  %v2560_v60 = vld [vmem:[%s3488_s7] ss:$0 sm:$0xff] }
 0x461   : > { %v1464_v62 = vcombine.low %v1440_v58, %v1456_v55  ;;  %v1465_v63 = vcombine.high %v1440_v58, %v1456_v55  ;;  %v1480_v0 = vcombine.low %v1447_v59, %v1463_v56  ;;  %v1481_v2 = vcombine.high %v1447_v59, %v1463_v56  ;;  %v2764_v4 = vpop.f32.mrf.mxu0  ;;  %v2903_v55 = vld [vmem:[%s3490_s9] sm:$0xff]   ;;  %2775 = vmatprep.subr.bf16.mxu0 %v2960_v1 }
 0x462   : > { %v2758_v6 = vpop.f32.mrf.mxu1 }
 0x463   : > { %v1472_v8 = vrot.slane %v1464_v62, %v3114_v28  ;;  %v1479_v9 = vrot.slane %v1465_v63, %v3114_v28  ;;  %v1488_v10 = vrot.slane %v1480_v0, %v3114_v28  ;;  %v1495_v11 = vrot.slane %v1481_v2, %v3114_v28  ;;  %v2561_v62 = vld [vmem:[%s3489_s8] ss:$0 sm:$0xff]  ;;  %v2904_v2 = vld [vmem:[%s3490_s9 + $0x18] sm:$0xff]   ;;  %v2905_v6 = vld [vmem:[%s3490_s9 + $0x10] sm:$0xff]  }
 0x464   : > { %2776 = vmatpush3.bf16.msra.mxu0 %v2902_v54 }
 0x465   : > { %v1500_v12 = vcombine.low %v1472_v8, %v1479_v9  ;;  %v2554_v14 = vcombine.high %v1472_v8, %v1479_v9  ;;  %v1516_v15 = vcombine.low %v1488_v10, %v1495_v11  ;;  %v2555_v16 = vcombine.high %v1488_v10, %v1495_v11  ;;  %2789 = vmatprep.subr.bf16.mxu0 %v2960_v1  ;;  %v2907_v8 = vld [vmem:[%s3492_s11 + $0x10] sm:$0xff]   ;;  %v2908_v9 = vld [vmem:[%s3492_s11 + $0x8] sm:$0xff]   ;;  %v2909_v10 = vld [vmem:[%s3492_s11 + $0x38] sm:$0xff]  }
 0x466   : > { %v2910_v11 = vld [vmem:[%s3492_s11] sm:$0xff]  }
 0x467   : > { %v1507_v18 = vrot.slane %v1500_v12, %v3112_v21  ;;  %v1515_v19 = vrot.slane %v2554_v14, %v3112_v21  ;;  %v1523_v23 = vrot.slane %v1516_v15, %v3112_v21  ;;  %v1531_v24 = vrot.slane %v2555_v16, %v3112_v21  ;;  %v2911_v12 = vld [vmem:[%s3492_s11 + $0x30] sm:$0xff]   ;;  %v2912_v14 = vld [vmem:[%s3492_s11 + $0x28] sm:$0xff]   ;;  %v2914_v15 = vld [vmem:[%s3492_s11 + $0x20] sm:$0xff]  }
 0x468   : > { %v2562_v16 = vld [vmem:[%s3487_s6] ss:$0 sm:$0xff] }
 0x469   : > { %v1533_v25 = vcombine.high %v1507_v18, %v1515_v19  ;;  %v1549_v26 = vcombine.high %v1523_v23, %v1531_v24  ;;  %v1532_v27 = vcombine.low %v1507_v18, %v1515_v19  ;;  %v1548_v29 = vcombine.low %v1523_v23, %v1531_v24 }
 0x46b   : > { %v1547_v30 = vrot.slane %v1533_v25, %v3114_v28  ;;  %v1563_v31 = vrot.slane %v1549_v26, %v3114_v28  ;;  %v1540_v34 = vrot.slane %v1532_v27, %v3114_v28  ;;  %v1556_v20 = vrot.slane %v1548_v29, %v3114_v28 }
 0x46d   : > { %v1566_v22 = vcombine.low %v1547_v30, %v1563_v31  ;;  %v1565_v35 = vcombine.high %v1540_v34, %v1556_v20  ;;  %v1564_v7 = vcombine.low %v1540_v34, %v1556_v20  ;;  %v1567_v21 = vcombine.high %v1547_v30, %v1563_v31  ;;  %v2913_v34 = vld [vmem:[%s3490_s9 + $0x28] sm:$0xff]  }
 0x46f   : > { %1573 = vrot.lane.b32.xlu1 %v1566_v22, %s2975_s20  ;;  %1569 = vrot.lane.b32.xlu0 %v1565_v35, %s2976_s21  ;;  %s489_s21 = scalar_lea.vmem %s3496_s15, %s2530_s24 }
 0x473   : > { %1577 = vrot.lane.b32.xlu1 %v1567_v21, %s2977_s22 }
 0x4e1   : > { %v1574_v36 = vpop.permute.xlu1 %1573  ;;  %v1570_v37 = vpop.permute.xlu0 %1569 }
 0x4e2   : > { %v1580_v38 = vsel %vm1014_vm2, %v1564_v7, %v1570_v37  ;;  %v2581_v7 = vld [vmem:[%s3491_s10 + $0x1] ss:$0 sm:$0xff] }
 0x4e3   : > { %v1582_v40 = vsel %vm1581_vm4, %v1580_v38, %v1574_v36  ;;  %v2915_v36 = vld [vmem:[%s3490_s9 + $0x20] sm:$0xff]  }
 0x4e5   : > { %v1578_v39 = vpop.permute.xlu1 %1577 }
 0x4e6   : > { %v1584_v41 = vsel %vm1583_vm5, %v1582_v40, %v1578_v39 }
 0x4e7   : > { %v1585_v28 = vpack.c.bf16 %v1584_v41, %v1584_v41  ;;  %v2916_v41 = vld [vmem:[%s3490_s9 + $0x38] sm:$0xff]  }
 0x4e9   : > { %2770 = vmatmul.mubr.msk.bf16.vlgmr.msra.gmra.mxu1 %vm516_vm1, %v1585_v28 }
 0x4ea   : > { %2785 = vmatprep.mubr.msk.bf16.mxu1 %vm2961_vm0, %v2960_v1 }
 0x5a9   : > { %v1646_v43 = vpop.f32.mrf.mxu1 }
 0x5aa   : > { %v1647_v44 = vadd.f32 %v2556_v42, %v1646_v43  ;;  %v2917_v43 = vld [vmem:[%s3490_s9 + $0x30] sm:$0xff]  }
 0x5ab   : > { %v2771_v45 = vpop.f32.mrf.mxu1 }
 0x5ac   : > { %v1652_v46 = vadd.f32 %v1647_v44, %v3092_v3  ;;  %v2901_v3 = vld [vmem:[%s3490_s9 + $0x8] sm:$0xff]   ;;  %v2918_v44 = vld [vmem:[%s3492_s11 + $0x58] sm:$0xff]   ;;  %v2919_v45 = vld [vmem:[%s3492_s11 + $0x50] sm:$0xff]  }
 0x5ad   : > { %v1649_v32 = vpop.f32.mrf.mxu1  ;;  %2782 = vmatpush3.bf16.msra.mxu1 %v2901_v3 }
 0x5ae   : > { %v1653_v47 = vsel %vm516_vm1, %v1652_v46, 0.0  ;;  %2783 = vmatprep.subr.bf16.mxu1 %v2960_v1  ;;  %v2921_v32 = vld [vmem:[%s3492_s11 + $0x78] sm:$0xff]  }
 0x5af   : > { %1654 = vadd.xlane.f32.xlu0 %v1653_v47  ;;  %v2772_v33 = vpop.f32.mrf.mxu1  ;;  %v2922_v47 = vld [vmem:[%s3492_s11 + $0x40] sm:$0xff]  }
 0x5b0   : > { %v2923_v33 = vld [vmem:[%s3492_s11 + $0x70] sm:$0xff]  }
 0x5b1   : > { %2784 = vmatpush3.bf16.msra.mxu1 %v2903_v55 }
 0x5b2   : > { %2801 = vmatprep.subr.bf16.mxu1 %v2960_v1 }
 0x638   : > { %v1655_v48 = vpop.xlane.xlu0 %1654 }
 0x639   : > { %v1657_v49 = vmul.f32 0.03125, %v1655_v48  ;;  %v2924_v48 = vld [vmem:[%s3492_s11 + $0x68] sm:$0xff]  }
 0x63b   : > { %v1658_v50 = vsub.f32 %v1652_v46, %v1657_v49  ;;  %v2920_v46 = vld [vmem:[%s3492_s11 + $0x48] sm:$0xff]   ;;  %v2925_v49 = vld [vmem:[%s3492_s11 + $0x60] sm:$0xff]  }
 0x63d   : > { %v1659_v51 = vmul.f32 %v1658_v50, %v1658_v50 }
 0x63f   : > { %v1660_v52 = vsel %vm516_vm1, %v1659_v51, 0.0 }
 0x640   : > { %1661 = vadd.xlane.f32.xlu1 %v1660_v52 }
 0x6c9   : > { %v1662_v56 = vpop.xlane.xlu1 %1661 }
 0x6ca   : > { %v1663_v57 = vmul.f32 0.03125, %v1662_v56 }
 0x6cc   : > { %v1664_v58 = vadd.f32 1e-05, %v1663_v57 }
 0x6ce   : > { %2942 = vrsqrt.f32 %v1664_v58 }
 0x6db   : > { %v2943_v59 = vpop.eup %2942 }
 0x6dc   : > { %v1666_v61 = vmul.f32 %v2943_v59, %v1658_v50 }
 0x6de   : > { %v1674_v63 = vmul.f32 %v2560_v60, %v1666_v61 }
 0x6e0   : > { %v3290_v0 = vadd.f32 %v2561_v62, %v1674_v63 }
 0x6e2   : > { %v3297_v4 = vpack.c.bf16 %v3290_v0, %v3290_v0 }
 0x6e4   : > { %2778 = vmatmul.mubr.msk.bf16.vlgmr.msra.gmra.mxu0 %vm516_vm1, %v3297_v4  ;;  %2786 = vmatmul.mubr.msk.bf16.vlgmr.msra.gmra.mxu1 %vm516_vm1, %v3297_v4 }
 0x6e5   : > { %2802 = vmatpush3.bf16.msra.mxu1 %v2904_v2  ;;  %2805 = vmatprep.mubr.msk.bf16.mxu1 %vm2961_vm0, %v2960_v1 }
 0x6e6   : > { %2803 = vmatprep.subr.bf16.mxu1 %v2960_v1  ;;  %2790 = vmatpush3.bf16.msra.mxu0 %v2906_v5 }
 0x6e7   : > { %2791 = vmatprep.subr.bf16.mxu0 %v2960_v1  ;;  %2797 = vmatprep.mubr.msk.bf16.mxu0 %vm2961_vm0, %v2960_v1 }
 0x6e9   : > { %2804 = vmatpush3.bf16.msra.mxu1 %v2905_v6 }
 0x6ea   : > { %2792 = vmatpush3.bf16.msra.mxu0 %v2907_v8  ;;  %2809 = vmatprep.subr.bf16.mxu1 %v2960_v1 }
 0x6eb   : > { %2793 = vmatprep.subr.bf16.mxu0 %v2960_v1 }
 0x6ec   : > { %2806 = vmatmul.mubr.msk.bf16.vlgmr.msra.gmra.mxu1 %vm516_vm1, %v3297_v4 }
 0x6ed   : > { %2817 = vmatprep.mubr.msk.bf16.mxu1 %vm2961_vm0, %v2960_v1  ;;  %2810 = vmatpush3.bf16.msra.mxu1 %v2909_v10 }
 0x6ee   : > { %2794 = vmatpush3.bf16.msra.mxu0 %v2908_v9  ;;  %2811 = vmatprep.subr.bf16.mxu1 %v2960_v1  ;;  %v2629_v9 = vld [vmem:[%s3491_s10 + $0x3] ss:$0 sm:$0xff] }
 0x6ef   : > { %2795 = vmatprep.subr.bf16.mxu0 %v2960_v1 }
 0x6f1   : > { %2812 = vmatpush3.bf16.msra.mxu1 %v2911_v12 }
 0x6f2   : > { %2796 = vmatpush3.bf16.msra.mxu0 %v2910_v11  ;;  %2813 = vmatprep.subr.bf16.mxu1 %v2960_v1 }
 0x6f3   : > { %2821 = vmatprep.subr.bf16.mxu0 %v2960_v1 }
 0x6f5   : > { %2814 = vmatpush3.bf16.msra.mxu1 %v2912_v14 }
 0x6f6   : > { %2815 = vmatprep.subr.bf16.mxu1 %v2960_v1 }
 0x6f9   : > { %2816 = vmatpush3.bf16.msra.mxu1 %v2914_v15 }
 0x6fa   : > { %2841 = vmatprep.subr.bf16.mxu1 %v2960_v1 }
 0x7a4   : > { %v1744_v18 = vpop.f32.mrf.mxu0  ;;  %v1873_v19 = vpop.f32.mrf.mxu1 }
 0x7a5   : > { %v3354_v23 = vadd.f32 %v2562_v16, %v1744_v18  ;;  %v1874_v24 = vadd.f32 %v2566_v17, %v1873_v19 }
 0x7a6   : > { %v2779_v25 = vpop.f32.mrf.mxu0  ;;  %v2787_v26 = vpop.f32.mrf.mxu1 }
 0x7a7   : > { %v1879_v27 = vmax.f32 %v1874_v24, 0.0  ;;  %v1751_v29 = vsel %vm1750_vm6, %v3354_v23, -inf }
 0x7a8   : > { %v1876_v30 = vpop.f32.mrf.mxu1  ;;  %1752 = vmax.xlane.f32.xlu0 %v1751_v29  ;;  %v1747_v31 = vpop.f32.mrf.mxu0 }
 0x7a9   : > { %v1880_v20 = vpack.c.bf16 %v1879_v27, %v1879_v27 }
 0x7aa   : > { %v2780_v22 = vpop.f32.mrf.mxu0  ;;  %v2788_v35 = vpop.f32.mrf.mxu1 }
 0x7ab   : > { %2798 = vmatmul.mubr.msk.bf16.vlgmr.msra.gmra.mxu0 %vm1920_vm7, %v1880_v20  ;;  %v1763_v22 = vand.u32 127, %v599_v13 }
 0x7ac   : > { %v2030_v21 = vpop.f32.mrf.mxu1  ;;  %2822 = vmatpush3.bf16.msra.mxu0 %v2913_v34  ;;  %2825 = vmatprep.mubr.msk.bf16.mxu0 %vm2961_vm0, %v2960_v1 }
 0x7ad   : > { %v2031_v37 = vadd.f32 %v2581_v7, %v2030_v21  ;;  %2823 = vmatprep.subr.bf16.mxu0 %v2960_v1 }
 0x7ae   : > { %v2807_v38 = vpop.f32.mrf.mxu1 }
 0x7af   : > { %v2036_v39 = vmax.f32 %v2031_v37, 0.0 }
 0x7b0   : > { %v2033_v40 = vpop.f32.mrf.mxu1  ;;  %2824 = vmatpush3.bf16.msra.mxu0 %v2915_v36 }
 0x7b1   : > { %v2037_v28 = vpack.c.bf16 %v2036_v39, %v2036_v39  ;;  %2829 = vmatprep.subr.bf16.mxu0 %v2960_v1 }
 0x7b2   : > { %v2808_v42 = vpop.f32.mrf.mxu1 }
 0x7b3   : > { %2818 = vmatmul.mubr.msk.bf16.vlgmr.msra.gmra.mxu1 %vm1920_vm7, %v2037_v28  ;;  %2826 = vmatmul.mubr.msk.bf16.vlgmr.msra.gmra.mxu0 %vm516_vm1, %v3297_v4 }
 0x7b4   : > { %2842 = vmatpush3.bf16.msra.mxu1 %v2916_v41  ;;  %2845 = vmatprep.mubr.msk.bf16.mxu1 %vm2961_vm0, %v2960_v1 }
 0x7b5   : > { %2843 = vmatprep.subr.bf16.mxu1 %v2960_v1  ;;  %2837 = vmatprep.mubr.msk.bf16.mxu0 %vm2961_vm0, %v2960_v1 }
 0x7b6   : > { %2830 = vmatpush3.bf16.msra.mxu0 %v2918_v44 }
 0x7b7   : > { %2831 = vmatprep.subr.bf16.mxu0 %v2960_v1 }
 0x7b8   : > { %2844 = vmatpush3.bf16.msra.mxu1 %v2917_v43 }
 0x7b9   : > { %2849 = vmatprep.subr.bf16.mxu1 %v2960_v1 }
 0x7ba   : > { %2832 = vmatpush3.bf16.msra.mxu0 %v2919_v45 }
 0x7bb   : > { %2846 = vmatmul.mubr.msk.bf16.vlgmr.msra.gmra.mxu1 %vm516_vm1, %v3297_v4  ;;  %2833 = vmatprep.subr.bf16.mxu0 %v2960_v1 }
 0x7bc   : > { %2857 = vmatprep.mubr.msk.bf16.mxu1 %vm2961_vm0, %v2960_v1  ;;  %2850 = vmatpush3.bf16.msra.mxu1 %v2921_v32 }
 0x7bd   : > { %2851 = vmatprep.subr.bf16.mxu1 %v2960_v1 }
 0x7be   : > { %2834 = vmatpush3.bf16.msra.mxu0 %v2920_v46 }
 0x7bf   : > { %2835 = vmatprep.subr.bf16.mxu0 %v2960_v1 }
 0x7c0   : > { %2852 = vmatpush3.bf16.msra.mxu1 %v2923_v33 }
 0x7c1   : > { %2853 = vmatprep.subr.bf16.mxu1 %v2960_v1 }
 0x7c2   : > { %2836 = vmatpush3.bf16.msra.mxu0 %v2922_v47 }
 0x7c4   : > { %2854 = vmatpush3.bf16.msra.mxu1 %v2924_v48 }
 0x7c5   : > { %2855 = vmatprep.subr.bf16.mxu1 %v2960_v1  ;;  %v2605_v1 = vld [vmem:[%s3491_s10 + $0x2] ss:$0 sm:$0xff] }
 0x7c8   : > { %2856 = vmatpush3.bf16.msra.mxu1 %v2925_v49 }
 0x831   : > { %v1753_v50 = vpop.xlane.xlu0 %1752 }
 0x832   : > { %v1754_v51 = vsub.f32 %v3354_v23, %v1753_v50 }
 0x834   : > { %v1755_v52 = vmul.f32 1.442695, %v1754_v51 }
 0x836   : > { %2944 = vpow2.f32 %v1755_v52 }
 0x843   : > { %v2945_v53 = vpop.eup %2944 }
 0x844   : > { %v1757_v3 = vsel %vm1750_vm6, %v2945_v53, 0.0 }
 0x845   : > { %1758 = vadd.xlane.f32.xlu0 %v1757_v3 }
 0x86b   : > { %v3423_v54 = vpop.f32.mrf.mxu0 }
 0x86d   : > { %v2799_v55 = vpop.f32.mrf.mxu0 }
 0x86f   : > { %v1961_v56 = vpop.f32.mrf.mxu0 }
 0x871   : > { %v2800_v57 = vpop.f32.mrf.mxu0 }
 0x873   : > { %v3428_v58 = vpop.f32.mrf.mxu1  ;;  %v2187_v59 = vpop.f32.mrf.mxu0 }
 0x874   : > { %v2188_v60 = vadd.f32 %v2605_v1, %v2187_v59 }
 0x875   : > { %v2819_v61 = vpop.f32.mrf.mxu1  ;;  %v2827_v62 = vpop.f32.mrf.mxu0 }
 0x876   : > { %v2193_v63 = vmax.f32 %v2188_v60, 0.0 }
 0x877   : > { %v2119_v2 = vpop.f32.mrf.mxu1  ;;  %v2190_v4 = vpop.f32.mrf.mxu0 }
 0x878   : > { %v2194_v5 = vpack.c.bf16 %v2193_v63, %v2193_v63  ;;  %v2978_v63 = vmov 1   ;;  %v2979_v2 = vmov 0  }
 0x879   : > { %v2820_v6 = vpop.f32.mrf.mxu1  ;;  %v2828_v8 = vpop.f32.mrf.mxu0  ;;  %2892 = vset.pattern.permute.xlu1 %v2978_v63  ;;  %2891 = vset.pattern.permute.xlu0 %v2979_v2 }
 0x87a   : > { %2838 = vmatmul.mubr.msk.bf16.vlgmr.msra.gmra.mxu0 %vm1920_vm7, %v2194_v5  ;;  %v2980_v8 = vmov 2  }
 0x87b   : > { %v2344_v10 = vpop.f32.mrf.mxu1 }
 0x87c   : > { %v2345_v11 = vadd.f32 %v2629_v9, %v2344_v10  ;;  %v2981_v9 = vmov 3   ;;  %v2570_v10 = vld [vmem:[%s3493_s12] ss:$0 sm:$0xff] }
 0x87d   : > { %v2847_v12 = vpop.f32.mrf.mxu1 }
 0x87e   : > { %v2350_v14 = vmax.f32 %v2345_v11, 0.0  ;;  %v2594_v11 = vld [vmem:[%s3493_s12 + $0x1] ss:$0 sm:$0xff]  ;;  %v1959_v12 = vadd.f32 %v2570_v10, %v3423_v54  ;;  %v2642_v54 = vld [vmem:[%s3493_s12 + $0x3] ss:$0 sm:$0xff] }
 0x87f   : > { %v2347_v15 = vpop.f32.mrf.mxu1 }
 0x880   : > { %v2351_v16 = vpack.c.bf16 %v2350_v14, %v2350_v14 }
 0x881   : > { %v2848_v17 = vpop.f32.mrf.mxu1 }
 0x882   : > { %2858 = vmatmul.mubr.msk.bf16.vlgmr.msra.gmra.mxu1 %vm1920_vm7, %v2351_v16  ;;  %v2117_v16 = vadd.f32 %v2594_v11, %v3428_v58  ;;  %v2618_v17 = vld [vmem:[%s3493_s12 + $0x2] ss:$0 sm:$0xff] }
 0x8ce   : > { %v1759_v18 = vpop.xlane.xlu0 %1758 }
 0x8cf   : > { %2946 = vrcp.f32 %v1759_v18 }
 0x8dc   : > { %v2947_v19 = vpop.eup %2946 }
 0x8dd   : > { %v1761_v23 = vmul.f32 %v2947_v19, %v2945_v53 }
 0x8df   : > { %v1764_v24 = vsel %vm1750_vm6, %v1761_v23, -inf }
 0x8e0   : > { %1765 = vmax.xlane.f32.xlu1 %v1764_v24 }
 0x93a   : > { %v3436_v25 = vpop.f32.mrf.mxu0 }
 0x93b   : > { %v2274_v24 = vadd.f32 %v2618_v17, %v3436_v25 }
 0x93c   : > { %v2839_v26 = vpop.f32.mrf.mxu0 }
 0x93e   : > { %v2276_v27 = vpop.f32.mrf.mxu0 }
 0x940   : > { %v2840_v29 = vpop.f32.mrf.mxu0 }
 0x942   : > { %v3438_v30 = vpop.f32.mrf.mxu1 }
 0x943   : > { %v2431_v58 = vadd.f32 %v2642_v54, %v3438_v30  ;;  %v2648_v30 = vld [vmem:[%s3494_s13] ss:$0 sm:$0xff] }
 0x944   : > { %v2859_v31 = vpop.f32.mrf.mxu1 }
 0x946   : > { %v2433_v34 = vpop.f32.mrf.mxu1 }
 0x948   : > { %v2860_v20 = vpop.f32.mrf.mxu1 }
 0x969   : > { %v1766_v35 = vpop.xlane.xlu1 %1765 }
 0x96a   : > { %vm1767_vm8 = vcmp.eq.f32.partialorder %v1761_v23, %v1766_v35 }
 0x96b   : > { %v1768_v7 = vsel %vm1767_vm8, %v1763_v22, 4 }
 0x96c   : > { %v1769_v21 = vsel %vm1750_vm6, %v1768_v7, 2147483647 }
 0x96d   : > { %v1771_v36 = vshra.s32 %v1769_v21, 16  ;;  %v1770_v38 = vand.u32 65535, %v1769_v21 }
 0x96f   : > { %v1773_v37 = vcvt.s32.f32 %v1771_v36  ;;  %v1772_v40 = vcvt.s32.f32 %v1770_v38 }
 0x971   : > { %1774 = vmin.xlane.f32.xlu0 %v1773_v37 }
 0x9fa   : > { %v1775_v39 = vpop.xlane.xlu0 %1774 }
 0x9fb   : > { %vm1776_vm9 = vcmp.eq.f32.partialorder %v1773_v37, %v1775_v39  ;;  %v1781_v28 = vcvt.f32.s32 %v1775_v39 }
 0x9fc   : > { %v1777_v41 = vsel %vm1776_vm9, %v1772_v40, inf }
 0x9fd   : > { %1778 = vmin.xlane.f32.xlu1 %v1777_v41  ;;  %v1782_v43 = vshll.u32 %v1781_v28, 16  ;;  %v2649_v28 = vld [vmem:[%s3495_s14] ss:$0 sm:$0xff] }
 0xa86   : > { %v1779_v42 = vpop.xlane.xlu1 %1778 }
 0xa87   : > { %v1780_v44 = vcvt.f32.s32 %v1779_v42 }
 0xa89   : > { %v1783_v45 = vadd.s32 %v1782_v43, %v1780_v44 }
 0xa8b   : > { %vm1784_vm10 = vcmp.eq.s32.totalorder %v1763_v22, %v1783_v45 }
 0xa8c   : > { %v1787_v13 = vsel %vm1784_vm10, -1.0, %v1761_v23  ;;  %v1785_v59 = vsel %vm1784_vm10, %v1761_v23, 0.0 }
 0xa8d   : > { %v1788_v46 = vsel %vm1750_vm6, %v1787_v13, -inf }
 0xa8e   : > { %1789 = vmax.xlane.f32.xlu0 %v1788_v46 }
 0xb17   : > { %v1790_v32 = vpop.xlane.xlu0 %1789 }
 0xb18   : > { %vm1791_vm11 = vcmp.eq.f32.partialorder %v1787_v13, %v1790_v32 }
 0xb19   : > { %v1792_v47 = vsel %vm1791_vm11, %v1763_v22, 4 }
 0xb1a   : > { %v1793_v33 = vsel %vm1750_vm6, %v1792_v47, 2147483647 }
 0xb1b   : > { %v1795_v48 = vshra.s32 %v1793_v33, 16  ;;  %v1794_v50 = vand.u32 65535, %v1793_v33 }
 0xb1d   : > { %v1797_v49 = vcvt.s32.f32 %v1795_v48  ;;  %v1796_v52 = vcvt.s32.f32 %v1794_v50 }
 0xb1f   : > { %1798 = vmin.xlane.f32.xlu1 %v1797_v49 }
 0xba8   : > { %v1799_v51 = vpop.xlane.xlu1 %1798 }
 0xba9   : > { %vm1800_vm12 = vcmp.eq.f32.partialorder %v1797_v49, %v1799_v51  ;;  %v1805_v3 = vcvt.f32.s32 %v1799_v51 }
 0xbaa   : > { %v1801_v53 = vsel %vm1800_vm12, %v1796_v52, inf }
 0xbab   : > { %1802 = vmin.xlane.f32.xlu0 %v1801_v53  ;;  %v1806_v56 = vshll.u32 %v1805_v3, 16 }
 0xc34   : > { %v1803_v55 = vpop.xlane.xlu0 %1802 }
 0xc35   : > { %v1804_v57 = vcvt.f32.s32 %v1803_v55 }
 0xc37   : > { %v1807_v1 = vadd.s32 %v1806_v56, %v1804_v57 }
 0xc39   : > { %vm1808_vm13 = vcmp.eq.s32.totalorder %v1763_v22, %v1807_v1 }
 0xc3a   : > { %v1809_v60 = vsel %vm1808_vm13, %v1787_v13, 0.0 }
 0xc3b   : > { %v1810_v61 = vadd.f32 %v1809_v60, %v1785_v59 }
 0xc3d   : > { %v1811_v62 = vsel %vm1750_vm6, %v1810_v61, 0.0 }
 0xc3e   : > { %1812 = vadd.xlane.f32.xlu1 %v1811_v62 }
 0xcc7   : > { %v1813_v4 = vpop.xlane.xlu1 %1812 }
 0xcc8   : > { %2948 = vrcp.f32 %v1813_v4 }
 0xcd5   : > { %v2949_v5 = vpop.eup %2948 }
 0xcd6   : > { %v1815_v6 = vmul.f32 %v2949_v5, %v1810_v61 }
 0xcd8   : > { %2123 = vperm.xlu1 %2892, %v1815_v6   ;;  %1966 = vperm.xlu0 %2891, %v1815_v6  }
 0xcdc   : > { %2893 = vset.pattern.permute.xlu1 %v2980_v8  ;;  %2895 = vset.pattern.permute.xlu0 %v2981_v9 }
 0xcdd   : > { %2280 = vperm.xlu1 %2893, %v1815_v6  }
 0xce1   : > { %2894 = vset.pattern.permute.xlu1 %v2981_v9 }
 0xce2   : > { %2437 = vperm.xlu1 %2894, %v1815_v6  }
 0xd53   : > { %v2124_v14 = vpop.permute.xlu1 %2123  ;;  %v1967_v15 = vpop.permute.xlu0 %1966 }
 0xd54   : > { %v1969_v18 = vmul.f32 %v1967_v15, %v1959_v12  ;;  %v2126_v19 = vmul.f32 %v2124_v14, %v2117_v16 }
 0xd56   : > { %v1970_v23 = vadd.f32 %v1969_v18, %v3290_v0 }
 0xd58   : > { %v2281_v26 = vpop.permute.xlu1 %2280  ;;  %v2127_v27 = vadd.f32 %v2126_v19, %v1970_v23 }
 0xd59   : > { %v2283_v29 = vmul.f32 %v2281_v26, %v2274_v24 }
 0xd5b   : > { %v2284_v31 = vadd.f32 %v2283_v29, %v2127_v27 }
 0xd5d   : > { %v2438_v34 = vpop.permute.xlu1 %2437 }
 0xd5e   : > { %v2440_v20 = vmul.f32 %v2438_v34, %v2431_v58 }
 0xd60   : > { %v2441_v22 = vadd.f32 %v2440_v20, %v2284_v31 }
 0xd62   : > { %v2442_v35 = vsel %vm516_vm1, %v2441_v22, 0.0 }
 0xd63   : > { %2443 = vadd.xlane.f32.xlu1 %v2442_v35 }
 0xdec   : > { %v2444_v0 = vpop.xlane.xlu1 %2443 }
 0xded   : > { %v2445_v7 = vmul.f32 0.03125, %v2444_v0 }
 0xdef   : > { %v2446_v25 = vsub.f32 %v2441_v22, %v2445_v7 }
 0xdf1   : > { %v2447_v21 = vmul.f32 %v2446_v25, %v2446_v25 }
 0xdf3   : > { %v2448_v36 = vsel %vm516_vm1, %v2447_v21, 0.0 }
 0xdf4   : > { %2449 = vadd.xlane.f32.xlu0 %v2448_v36 }
 0xe7d   : > { %v2450_v37 = vpop.xlane.xlu0 %2449 }
 0xe7e   : > { %v2451_v38 = vmul.f32 0.03125, %v2450_v37 }
 0xe80   : > { %v2452_v39 = vadd.f32 1e-05, %v2451_v38 }
 0xe82   : > { %2950 = vrsqrt.f32 %v2452_v39 }
 0xe8f   : > { %v2951_v40 = vpop.eup %2950 }
 0xe90   : > { %v2454_v41 = vmul.f32 %v2951_v40, %v2446_v25 }
 0xe92   : > { %v2462_v42 = vmul.f32 %v2648_v30, %v2454_v41 }
 0xe94   : > { %v2470_v43 = vadd.f32 %v2649_v28, %v2462_v42 }
 0xe96   : > { %2471 = vst.msk [vmem:[%s489_s21] sm:$0xff] %vm516_vm1, %v2470_v43 }
 0xe97 PF: > { %s25_s18 = sadd.s32 1, %s2958_s18  }
 0xe98   : > { %p22_p4 = scmp.ge.s32.totalorder %s25_s18, 4  }
 0xe9a   :  { %24 = sbr.rel (!%p22_p4) target bundleno = 1 (0x1), region = 122 }

</bundles_post_ra>
